<compile_context>
chip_gen: v7x
topology: tpu7x:2x2x1
jax: 0.10.0
libtpu: 0.0.40
codegen_flags: <defaults>
</compile_context>

<pallas_src>
import jax
import jax.numpy as jnp
from jax.experimental import pallas as pl
from jax.experimental.pallas import tpu as pltpu


# ----------------------------- helpers -----------------------------

def _round_up(x, m):
    return (x + m - 1) // m * m


def _layernorm(x, g, b, eps=1e-8):
    mu = jnp.mean(x, axis=-1, keepdims=True)
    var = jnp.mean((x - mu) ** 2, axis=-1, keepdims=True)
    return (x - mu) * jax.lax.rsqrt(var + eps) * g + b


def _pick_tb(B, Sp, target_rows=512):
    """Batch tile: divides B (no pad), ~target MXU rows, >=2 tiles if possible."""
    cap = max(1, target_rows // Sp)
    divs = [d for d in range(1, B + 1) if B % d == 0 and d <= cap]
    tb = max(divs) if divs else 1
    if tb == B and B > 1:                       # keep >=2 tiles for v7x megacore
        smaller = [d for d in divs if d < B]
        if smaller:
            tb = max(smaller)
    return tb


# packed per-layer weight / vector layout
# weights (L*6, D, D) bf16: rows [wq, wk, wv, wo, w1, w2] per layer
_WQ, _WK, _WV, _WO, _W1, _W2 = range(6)
# vectors (L, 16, D) f32:
_LN1_G, _LN1_B, _BQ, _BK, _BV, _BO, _LN2_G, _LN2_B, _B1, _B2 = range(10)
_NV = 16                                        # padded to a sublane multiple


# ----------------------------- kernels -----------------------------

def sasrec_blocks_kernel(causal_ref, x_ref, mask_ref, w_ref, vec_ref,
                         lastln_ref, out_ref):
    """All SASRec transformer blocks + final LayerNorm.

    grid = (batch-tile, layer); the output block (index constant over the
    layer axis) is the VMEM-resident running hidden state across layers.
    """
    l = pl.program_id(1)
    n_layers = pl.num_programs(1)

    @pl.when(l == 0)
    def _():
        out_ref[...] = x_ref[...]

    x = out_ref[...]                          # (TB, Sp, D) f32, resident
    TB, Sp, D = x.shape
    rows = TB * Sp

    x2 = x.reshape(rows, D)                   # layout no-op (Sp % 8 == 0)
    mask2 = mask_ref[...].reshape(rows, 1)
    vecs = vec_ref[0]                         # (16, D) f32, one small load

    # pre-attention LayerNorm (queries only, as in SASRec)
    q_in2 = _layernorm(x2, vecs[_LN1_G], vecs[_LN1_B])

    x_bf = x2.astype(jnp.bfloat16)
    q2 = jnp.dot(q_in2.astype(jnp.bfloat16), w_ref[_WQ],
                 preferred_element_type=jnp.float32) + vecs[_BQ]
    k2 = jnp.dot(x_bf, w_ref[_WK],
                 preferred_element_type=jnp.float32) + vecs[_BK]
    v2 = jnp.dot(x_bf, w_ref[_WV],
                 preferred_element_type=jnp.float32) + vecs[_BV]

    q3 = q2.reshape(TB, Sp, D).astype(jnp.bfloat16)
    k3 = k2.reshape(TB, Sp, D).astype(jnp.bfloat16)
    v3 = v2.reshape(TB, Sp, D).astype(jnp.bfloat16)

    scale = 1.0 / (D ** 0.5)
    scores = jnp.einsum('bqd,bkd->bqk', q3, k3,
                        preferred_element_type=jnp.float32) * scale
    scores = scores + causal_ref[...]         # additive causal bias (Sp, Sp)

    # softmax (f32)
    scores = scores - jnp.max(scores, axis=-1, keepdims=True)
    p = jnp.exp(scores)
    p = p * pl.reciprocal(jnp.sum(p, axis=-1, keepdims=True), approx=True)

    attn3 = jnp.einsum('bqk,bkd->bqd', p.astype(jnp.bfloat16), v3,
                       preferred_element_type=jnp.float32)
    attn2 = jnp.dot(attn3.reshape(rows, D).astype(jnp.bfloat16), w_ref[_WO],
                    preferred_element_type=jnp.float32) + vecs[_BO]

    # residual with layernormed queries, re-apply timeline mask
    seqs2 = (q_in2 + attn2) * mask2

    # FFN (1x1 convs == dense), residual over its layernormed input
    h2 = _layernorm(seqs2, vecs[_LN2_G], vecs[_LN2_B])
    ff = jnp.dot(h2.astype(jnp.bfloat16), w_ref[_W1],
                 preferred_element_type=jnp.float32) + vecs[_B1]
    ff = jnp.maximum(ff, 0.0)
    ff = jnp.dot(ff.astype(jnp.bfloat16), w_ref[_W2],
                 preferred_element_type=jnp.float32) + vecs[_B2]
    h2 = (h2 + ff) * mask2

    is_last = l == n_layers - 1

    @pl.when(jnp.logical_not(is_last))
    def _():
        out_ref[...] = h2.reshape(TB, Sp, D)

    @pl.when(is_last)
    def _():
        # final LayerNorm folded in: output is log_feats directly
        feats = _layernorm(h2, lastln_ref[0], lastln_ref[1])
        out_ref[...] = feats.reshape(TB, Sp, D)


def logits_kernel(feat_ref, embT_ref, out_ref):
    """Pure logits matmul; grid = (row-tile, V-tile), K=D fits one block."""
    out_ref[...] = jnp.dot(feat_ref[...].astype(jnp.bfloat16), embT_ref[...],
                           preferred_element_type=jnp.float32)


# ----------------------------- pallas wrappers -----------------------------

def run_blocks(seqs, mask, causal, blocks_w, blocks_v, last_ln, tb):
    B, Sp, D = seqs.shape
    L = blocks_v.shape[0]

    def act_spec():
        return pl.BlockSpec((tb, Sp, D), lambda b, l: (b, 0, 0))

    return pl.pallas_call(
        sasrec_blocks_kernel,
        out_shape=jax.ShapeDtypeStruct((B, Sp, D), jnp.float32),
        grid=(B // tb, L),
        in_specs=[
            pl.BlockSpec((Sp, Sp), lambda b, l: (0, 0)),          # causal bias
            act_spec(),                                           # x (layer-0 input)
            pl.BlockSpec((tb, Sp, 1), lambda b, l: (b, 0, 0)),    # timeline mask
            pl.BlockSpec((6, D, D), lambda b, l: (l, 0, 0)),      # packed weights
            pl.BlockSpec((1, _NV, D), lambda b, l: (l, 0, 0)),    # packed vectors
            pl.BlockSpec((2, D), lambda b, l: (0, 0)),            # last LN g/b
        ],
        out_specs=act_spec(),
        compiler_params=pltpu.CompilerParams(
            dimension_semantics=("parallel", "arbitrary")),
    )(causal, seqs, mask, blocks_w, blocks_v, last_ln)


def run_logits(flat, embT, tm, tv):
    Rp, D = flat.shape
    Vp = embT.shape[1]
    return pl.pallas_call(
        logits_kernel,
        out_shape=jax.ShapeDtypeStruct((Rp, Vp), jnp.float32),
        grid=(Rp // tm, Vp // tv),
        in_specs=[pl.BlockSpec((tm, D), lambda r, v: (r, 0)),
                  pl.BlockSpec((D, tv), lambda r, v: (0, v))],
        out_specs=pl.BlockSpec((tm, tv), lambda r, v: (r, v)),
        compiler_params=pltpu.CompilerParams(
            dimension_semantics=("parallel", "parallel")),
    )(flat, embT)


# ----------------------------- Tenc forward -----------------------------

def tenc_forward(states, params):
    """Tenc.forward: states (B,S) int32 -> (inputs_emb (B,S,D), logits (B*S,V))."""
    B, S = states.shape
    D = params["pos_emb"].shape[1]
    V = params["num_items"] + 1
    Sp = params["pos_emb"].shape[0]              # sublane-padded max_len

    # pad the sequence axis with padding item 0 (emb row 0 is zero, pos pad is
    # zero, timeline mask zero -> pad positions stay exactly zero and, thanks
    # to the causal bias, are never attended to by real positions).
    states_p = jnp.pad(states, ((0, 0), (0, Sp - S))) if Sp != S else states

    mask = (states_p != 0).astype(jnp.float32)[..., None]          # (B, Sp, 1)
    seqs = jnp.take(params["item_emb"], states_p, axis=0) * (D ** 0.5)
    seqs = seqs + params["pos_emb"][None, :, :]
    # TODO(synk): dropout is a no-op at inference time, omitted.
    seqs = seqs * mask

    # additive causal bias over the padded sequence
    idx = jnp.arange(Sp, dtype=jnp.int32)
    causal = jnp.where(idx[None, :] <= idx[:, None], 0.0, -1e30).astype(jnp.float32)

    tb = _pick_tb(B, Sp)
    feats = run_blocks(seqs, mask, causal, params["blocks_w"],
                       params["blocks_v"], params["last_ln"], tb)   # (B, Sp, D)

    inputs_emb = feats[:, :S, :]                                   # (B, S, D)

    # logits: tiled (R, D) x (D, Vp) matmul over the pre-transposed item table
    R = B * S
    tm = min(512, _round_up(R, 8))
    Rp = _round_up(R, tm)
    flat = inputs_emb.reshape(R, D)
    if Rp != R:
        flat = jnp.pad(flat, ((0, Rp - R), (0, 0)))

    embT = params["item_emb_T"]                                    # (D, Vp) bf16
    Vp = embT.shape[1]
    tv = 128
    for cand in range(min(2048, Vp), 127, -128):                   # largest tile dividing Vp
        if Vp % cand == 0:
            tv = cand
            break

    logits_p = run_logits(flat, embT, tm, tv)
    logits = logits_p[:R, :V]                                      # (B*S, V)
    return inputs_emb, logits


def tenc_predict(states, params):
    """Tenc.predict: scores of the last position, (B, V)."""
    B, S = states.shape
    _, logits = tenc_forward(states, params)
    return logits.reshape(B, S, -1)[:, -1, :]


# ----------------------------- parameter init -----------------------------

def init_params(key, num_items, maxlen, hidden, num_blocks):
    V = num_items + 1
    Vp = _round_up(V, 128)                      # lane-dense vocab pad only
    Sp = _round_up(maxlen, 8)                   # sublane-aligned sequence pad

    k_emb, k_pos, k_w = jax.random.split(key, 3)

    # item embeddings: (V, D) f32 for the gather, (D, Vp) bf16 for the logits MXU
    item_emb = 0.02 * jax.random.normal(k_emb, (V, hidden), jnp.float32)
    item_emb = item_emb.at[0].set(0.0)                       # padding item id 0
    item_emb_T = jnp.pad(item_emb, ((0, Vp - V), (0, 0))).T.astype(jnp.bfloat16)

    pos_emb = 0.02 * jax.random.normal(k_pos, (maxlen, hidden), jnp.float32)
    pos_emb = jnp.pad(pos_emb, ((0, Sp - maxlen), (0, 0)))   # (Sp, D), pad rows 0

    def w(i, j):
        kk = jax.random.fold_in(k_w, i * 6 + j)
        return (0.02 * jax.random.normal(kk, (hidden, hidden),
                                         jnp.float32)).astype(jnp.bfloat16)

    # packed weights: (L*6, D, D) bf16, rows [wq, wk, wv, wo, w1, w2] per layer
    blocks_w = jnp.stack([w(i, j) for i in range(num_blocks) for j in range(6)],
                         axis=0)

    # packed vectors: (L, 16, D) f32 (LN gains = 1, biases = 0)
    blocks_v = jnp.zeros((num_blocks, _NV, hidden), jnp.float32)
    blocks_v = blocks_v.at[:, _LN1_G, :].set(1.0)
    blocks_v = blocks_v.at[:, _LN2_G, :].set(1.0)

    last_ln = jnp.stack([jnp.ones((hidden,), jnp.float32),
                         jnp.zeros((hidden,), jnp.float32)], axis=0)   # (2, D)

    return {
        "num_items": num_items,
        "item_emb": item_emb,                   # (V, D) f32
        "item_emb_T": item_emb_T,               # (D, Vp) bf16
        "pos_emb": pos_emb,                     # (Sp, D) f32
        "last_ln": last_ln,                     # (2, D) f32
        "blocks_w": blocks_w,                   # (L*6, D, D) bf16
        "blocks_v": blocks_v,                   # (L, 16, D) f32
    }


# ----------------------------- main -----------------------------

if __name__ == "__main__":
    B, S, D = 2, 10, 128         # batch, max_len, hidden_units (module defaults)
    NUM_ITEMS = 300              # vocab = 301 (item 0 = padding)
    NUM_BLOCKS = 2

    key = jax.random.PRNGKey(0)
    pkey, skey = jax.random.split(key)
    params = init_params(pkey, NUM_ITEMS, S, D, NUM_BLOCKS)

    states = jax.random.randint(skey, (B, S), 0, NUM_ITEMS + 1, dtype=jnp.int32)

    inputs_emb, logits = tenc_forward(states, params)
    scores_last = tenc_predict(states, params)

    jax.block_until_ready((inputs_emb, logits, scores_last))

    assert inputs_emb.shape == (B, S, D)
    assert logits.shape == (B * S, NUM_ITEMS + 1)
    assert scores_last.shape == (B, NUM_ITEMS + 1)
    assert bool(jnp.all(jnp.isfinite(inputs_emb))) and bool(jnp.all(jnp.isfinite(logits)))

    print("KERNEL_OK")
</pallas_src>

<mosaic_0001>
module attributes {stable_mosaic.version = 11 : i64} {
  func.func @sasrec_blocks_kernel(%arg0: i32, %arg1: i32, %arg2: memref<16x16xf32, #tpu.memory_space<vmem>>, %arg3: memref<1x16x128xf32, #tpu.memory_space<vmem>>, %arg4: memref<1x16x1xf32, #tpu.memory_space<vmem>>, %arg5: memref<6x128x128xbf16, #tpu.memory_space<vmem>>, %arg6: memref<1x16x128xf32, #tpu.memory_space<vmem>>, %arg7: memref<2x128xf32, #tpu.memory_space<vmem>>, %arg8: memref<1x16x128xf32, #tpu.memory_space<vmem>>) attributes {dimension_semantics = [#tpu.dimension_semantics<parallel>, #tpu.dimension_semantics<arbitrary>], iteration_bounds = array<i64: 2, 2>, scalar_prefetch = 0 : i64, scratch_operands = 0 : i64, tpu.core_type = #tpu.core_type<tc>, window_params = [{pipeline_mode = #tpu.pipeline_mode<synchronous>, transform_indices = @transform_0, window_bounds = array<i64: 16, 16>}, {transform_indices = @transform_1, window_bounds = array<i64: 1, 16, 128>}, {transform_indices = @transform_2, window_bounds = array<i64: 1, 16, 1>}, {transform_indices = @transform_3, window_bounds = array<i64: 6, 128, 128>}, {transform_indices = @transform_4, window_bounds = array<i64: 1, 16, 128>}, {pipeline_mode = #tpu.pipeline_mode<synchronous>, transform_indices = @transform_5, window_bounds = array<i64: 2, 128>}, {transform_indices = @transform_6, window_bounds = array<i64: 1, 16, 128>}]} {
    %c0_i32 = arith.constant 0 : i32
    %0 = arith.cmpi eq, %arg1, %c0_i32 : i32
    %1 = arith.extui %0 : i1 to i32
    %c0_i32_0 = arith.constant 0 : i32
    %2 = arith.cmpi ne, %1, %c0_i32_0 : i32
    scf.if %2 {
      %c0_47 = arith.constant 0 : index
      %c0_48 = arith.constant 0 : index
      %c0_49 = arith.constant 0 : index
      %157 = vector.load %arg3[%c0_47, %c0_48, %c0_49] : memref<1x16x128xf32, #tpu.memory_space<vmem>>, vector<1x16x128xf32>
      %c0_50 = arith.constant 0 : index
      %c0_51 = arith.constant 0 : index
      %c0_52 = arith.constant 0 : index
      %158 = vector.load %arg8[%c0_50, %c0_51, %c0_52] : memref<1x16x128xf32, #tpu.memory_space<vmem>>, vector<1x16x128xf32>
      tpu.vector_store %arg8[%c0_50, %c0_51, %c0_52], %157 {strides = array<i32>} : memref<1x16x128xf32, #tpu.memory_space<vmem>>, vector<1x16x128xf32>,
    } else {
    }
    %c0 = arith.constant 0 : index
    %c0_1 = arith.constant 0 : index
    %c0_2 = arith.constant 0 : index
    %3 = vector.load %arg8[%c0, %c0_1, %c0_2] : memref<1x16x128xf32, #tpu.memory_space<vmem>>, vector<1x16x128xf32>
    %4 = vector.shape_cast %3 : vector<1x16x128xf32> to vector<16x128xf32>
    %c0_3 = arith.constant 0 : index
    %c0_4 = arith.constant 0 : index
    %c0_5 = arith.constant 0 : index
    %5 = vector.load %arg4[%c0_3, %c0_4, %c0_5] : memref<1x16x1xf32, #tpu.memory_space<vmem>>, vector<1x16x1xf32>
    %6 = vector.shape_cast %5 : vector<1x16x1xf32> to vector<16x1xf32>
    %c0_6 = arith.constant 0 : index
    %c0_7 = arith.constant 0 : index
    %c0_8 = arith.constant 0 : index
    %7 = vector.load %arg6[%c0_6, %c0_7, %c0_8] : memref<1x16x128xf32, #tpu.memory_space<vmem>>, vector<1x16x128xf32>
    %8 = vector.shape_cast %7 : vector<1x16x128xf32> to vector<16x128xf32>
    %9 = vector.extract_strided_slice %8 {offsets = [0, 0], sizes = [1, 128], strides = [1, 1]} : vector<16x128xf32> to vector<1x128xf32>
    %10 = vector.shape_cast %9 : vector<1x128xf32> to vector<128xf32>
    %11 = vector.extract_strided_slice %8 {offsets = [1, 0], sizes = [1, 128], strides = [1, 1]} : vector<16x128xf32> to vector<1x128xf32>
    %12 = vector.shape_cast %11 : vector<1x128xf32> to vector<128xf32>
    %cst = arith.constant dense<0.000000e+00> : vector<16xf32>
    %13 = vector.multi_reduction <add>, %4, %cst [1] : vector<16x128xf32> to vector<16xf32>
    %14 = vector.shape_cast %13 : vector<16xf32> to vector<16x1xf32>
    %cst_9 = arith.constant 1.280000e+02 : f32
    %15 = vector.broadcast %cst_9 : f32 to vector<16x1xf32>
    %16 = arith.divf %14, %15 : vector<16x1xf32>
    %17 = vector.broadcast %16 : vector<16x1xf32> to vector<16x128xf32>
    %18 = arith.subf %4, %17 : vector<16x128xf32>
    %19 = arith.mulf %18, %18 : vector<16x128xf32>
    %cst_10 = arith.constant dense<0.000000e+00> : vector<16xf32>
    %20 = vector.multi_reduction <add>, %19, %cst_10 [1] : vector<16x128xf32> to vector<16xf32>
    %21 = vector.shape_cast %20 : vector<16xf32> to vector<16x1xf32>
    %cst_11 = arith.constant 1.280000e+02 : f32
    %22 = vector.broadcast %cst_11 : f32 to vector<16x1xf32>
    %23 = arith.divf %21, %22 : vector<16x1xf32>
    %24 = vector.broadcast %16 : vector<16x1xf32> to vector<16x128xf32>
    %25 = arith.subf %4, %24 : vector<16x128xf32>
    %cst_12 = arith.constant 9.99999993E-9 : f32
    %26 = vector.broadcast %cst_12 : f32 to vector<16x1xf32>
    %27 = arith.addf %23, %26 : vector<16x1xf32>
    %28 = math.rsqrt %27 : vector<16x1xf32>
    %29 = vector.broadcast %28 : vector<16x1xf32> to vector<16x128xf32>
    %30 = arith.mulf %25, %29 : vector<16x128xf32>
    %31 = vector.shape_cast %10 : vector<128xf32> to vector<1x128xf32>
    %32 = vector.broadcast %31 : vector<1x128xf32> to vector<16x128xf32>
    %33 = arith.mulf %30, %32 : vector<16x128xf32>
    %34 = vector.shape_cast %12 : vector<128xf32> to vector<1x128xf32>
    %35 = vector.broadcast %34 : vector<1x128xf32> to vector<16x128xf32>
    %36 = arith.addf %33, %35 : vector<16x128xf32>
    %37 = arith.truncf %4 : vector<16x128xf32> to vector<16x128xbf16>
    %38 = arith.truncf %36 : vector<16x128xf32> to vector<16x128xbf16>
    %c0_13 = arith.constant 0 : index
    %c0_14 = arith.constant 0 : index
    %c0_15 = arith.constant 0 : index
    %39 = vector.load %arg5[%c0_13, %c0_14, %c0_15] : memref<6x128x128xbf16, #tpu.memory_space<vmem>>, vector<1x128x128xbf16>
    %40 = vector.shape_cast %39 : vector<1x128x128xbf16> to vector<128x128xbf16>
    %cst_16 = arith.constant dense<0.000000e+00> : vector<16x128xf32>
    %41 = tpu.matmul %38, %40, %cst_16 {dimension_numbers = #tpu.dot_dimension_numbers<[1], [0], [0], [1], [0, 0, 1, 1], [], []>} : vector<16x128xbf16>, vector<128x128xbf16>, vector<16x128xf32> -> vector<16x128xf32>
    %42 = vector.extract_strided_slice %8 {offsets = [2, 0], sizes = [1, 128], strides = [1, 1]} : vector<16x128xf32> to vector<1x128xf32>
    %43 = vector.shape_cast %42 : vector<1x128xf32> to vector<128xf32>
    %44 = vector.shape_cast %43 : vector<128xf32> to vector<1x128xf32>
    %45 = vector.broadcast %44 : vector<1x128xf32> to vector<16x128xf32>
    %46 = arith.addf %41, %45 : vector<16x128xf32>
    %c1 = arith.constant 1 : index
    %c0_17 = arith.constant 0 : index
    %c0_18 = arith.constant 0 : index
    %47 = vector.load %arg5[%c1, %c0_17, %c0_18] : memref<6x128x128xbf16, #tpu.memory_space<vmem>>, vector<1x128x128xbf16>
    %48 = vector.shape_cast %47 : vector<1x128x128xbf16> to vector<128x128xbf16>
    %cst_19 = arith.constant dense<0.000000e+00> : vector<16x128xf32>
    %49 = tpu.matmul %37, %48, %cst_19 {dimension_numbers = #tpu.dot_dimension_numbers<[1], [0], [0], [1], [0, 0, 1, 1], [], []>} : vector<16x128xbf16>, vector<128x128xbf16>, vector<16x128xf32> -> vector<16x128xf32>
    %50 = vector.extract_strided_slice %8 {offsets = [3, 0], sizes = [1, 128], strides = [1, 1]} : vector<16x128xf32> to vector<1x128xf32>
    %51 = vector.shape_cast %50 : vector<1x128xf32> to vector<128xf32>
    %52 = vector.shape_cast %51 : vector<128xf32> to vector<1x128xf32>
    %53 = vector.broadcast %52 : vector<1x128xf32> to vector<16x128xf32>
    %54 = arith.addf %49, %53 : vector<16x128xf32>
    %c2 = arith.constant 2 : index
    %c0_20 = arith.constant 0 : index
    %c0_21 = arith.constant 0 : index
    %55 = vector.load %arg5[%c2, %c0_20, %c0_21] : memref<6x128x128xbf16, #tpu.memory_space<vmem>>, vector<1x128x128xbf16>
    %56 = vector.shape_cast %55 : vector<1x128x128xbf16> to vector<128x128xbf16>
    %cst_22 = arith.constant dense<0.000000e+00> : vector<16x128xf32>
    %57 = tpu.matmul %37, %56, %cst_22 {dimension_numbers = #tpu.dot_dimension_numbers<[1], [0], [0], [1], [0, 0, 1, 1], [], []>} : vector<16x128xbf16>, vector<128x128xbf16>, vector<16x128xf32> -> vector<16x128xf32>
    %58 = vector.extract_strided_slice %8 {offsets = [4, 0], sizes = [1, 128], strides = [1, 1]} : vector<16x128xf32> to vector<1x128xf32>
    %59 = vector.shape_cast %58 : vector<1x128xf32> to vector<128xf32>
    %60 = vector.shape_cast %59 : vector<128xf32> to vector<1x128xf32>
    %61 = vector.broadcast %60 : vector<1x128xf32> to vector<16x128xf32>
    %62 = arith.addf %57, %61 : vector<16x128xf32>
    %63 = vector.shape_cast %46 : vector<16x128xf32> to vector<1x16x128xf32>
    %64 = arith.truncf %63 : vector<1x16x128xf32> to vector<1x16x128xbf16>
    %65 = vector.shape_cast %54 : vector<16x128xf32> to vector<1x16x128xf32>
    %66 = arith.truncf %65 : vector<1x16x128xf32> to vector<1x16x128xbf16>
    %67 = vector.shape_cast %62 : vector<16x128xf32> to vector<1x16x128xf32>
    %68 = arith.truncf %67 : vector<1x16x128xf32> to vector<1x16x128xbf16>
    "tpu.trace_start"() <{level = 10 : i32, message = "bqd,bkd->bqk"}> : () -> ()
    %cst_23 = arith.constant dense<0.000000e+00> : vector<1x16x16xf32>
    %69 = tpu.matmul %64, %66, %cst_23 {dimension_numbers = #tpu.dot_dimension_numbers<[2], [2], [1], [1], [0, 0, 0, 1, 1, 1], [0], [0]>} : vector<1x16x128xbf16>, vector<1x16x128xbf16>, vector<1x16x16xf32> -> vector<1x16x16xf32>
    "tpu.trace_stop"() : () -> ()
    %cst_24 = arith.constant 0.0883883461 : f32
    %70 = vector.broadcast %cst_24 : f32 to vector<1x16x16xf32>
    %71 = arith.mulf %69, %70 : vector<1x16x16xf32>
    %c0_25 = arith.constant 0 : index
    %c0_26 = arith.constant 0 : index
    %72 = vector.load %arg2[%c0_25, %c0_26] : memref<16x16xf32, #tpu.memory_space<vmem>>, vector<16x16xf32>
    %73 = vector.shape_cast %72 : vector<16x16xf32> to vector<1x16x16xf32>
    %74 = arith.addf %71, %73 : vector<1x16x16xf32>
    %cst_27 = arith.constant dense<0xFF800000> : vector<1x16xf32>
    %75 = vector.multi_reduction <maximumf>, %74, %cst_27 [2] : vector<1x16x16xf32> to vector<1x16xf32>
    %76 = vector.shape_cast %75 : vector<1x16xf32> to vector<1x16x1xf32>
    %77 = vector.broadcast %76 : vector<1x16x1xf32> to vector<1x16x16xf32>
    %78 = arith.subf %74, %77 : vector<1x16x16xf32>
    %79 = math.exp %78 : vector<1x16x16xf32>
    %cst_28 = arith.constant dense<0.000000e+00> : vector<1x16xf32>
    %80 = vector.multi_reduction <add>, %79, %cst_28 [2] : vector<1x16x16xf32> to vector<1x16xf32>
    %81 = vector.shape_cast %80 : vector<1x16xf32> to vector<1x16x1xf32>
    %82 = tpu.reciprocal %81 {approx = true} : vector<1x16x1xf32> -> vector<1x16x1xf32>
    %83 = vector.broadcast %82 : vector<1x16x1xf32> to vector<1x16x16xf32>
    %84 = arith.mulf %79, %83 : vector<1x16x16xf32>
    %85 = arith.truncf %84 : vector<1x16x16xf32> to vector<1x16x16xbf16>
    "tpu.trace_start"() <{level = 10 : i32, message = "bqk,bkd->bqd"}> : () -> ()
    %cst_29 = arith.constant dense<0.000000e+00> : vector<1x16x128xf32>
    %86 = tpu.matmul %85, %68, %cst_29 {dimension_numbers = #tpu.dot_dimension_numbers<[2], [1], [1], [2], [0, 0, 0, 1, 1, 2], [0], [0]>} : vector<1x16x16xbf16>, vector<1x16x128xbf16>, vector<1x16x128xf32> -> vector<1x16x128xf32>
    "tpu.trace_stop"() : () -> ()
    %87 = vector.shape_cast %86 : vector<1x16x128xf32> to vector<16x128xf32>
    %88 = arith.truncf %87 : vector<16x128xf32> to vector<16x128xbf16>
    %c3 = arith.constant 3 : index
    %c0_30 = arith.constant 0 : index
    %c0_31 = arith.constant 0 : index
    %89 = vector.load %arg5[%c3, %c0_30, %c0_31] : memref<6x128x128xbf16, #tpu.memory_space<vmem>>, vector<1x128x128xbf16>
    %90 = vector.shape_cast %89 : vector<1x128x128xbf16> to vector<128x128xbf16>
    %cst_32 = arith.constant dense<0.000000e+00> : vector<16x128xf32>
    %91 = tpu.matmul %88, %90, %cst_32 {dimension_numbers = #tpu.dot_dimension_numbers<[1], [0], [0], [1], [0, 0, 1, 1], [], []>} : vector<16x128xbf16>, vector<128x128xbf16>, vector<16x128xf32> -> vector<16x128xf32>
    %92 = vector.extract_strided_slice %8 {offsets = [5, 0], sizes = [1, 128], strides = [1, 1]} : vector<16x128xf32> to vector<1x128xf32>
    %93 = vector.shape_cast %92 : vector<1x128xf32> to vector<128xf32>
    %94 = vector.shape_cast %93 : vector<128xf32> to vector<1x128xf32>
    %95 = vector.broadcast %94 : vector<1x128xf32> to vector<16x128xf32>
    %96 = arith.addf %91, %95 : vector<16x128xf32>
    %97 = arith.addf %36, %96 : vector<16x128xf32>
    %98 = vector.broadcast %6 : vector<16x1xf32> to vector<16x128xf32>
    %99 = arith.mulf %97, %98 : vector<16x128xf32>
    %100 = vector.extract_strided_slice %8 {offsets = [6, 0], sizes = [1, 128], strides = [1, 1]} : vector<16x128xf32> to vector<1x128xf32>
    %101 = vector.shape_cast %100 : vector<1x128xf32> to vector<128xf32>
    %102 = vector.extract_strided_slice %8 {offsets = [7, 0], sizes = [1, 128], strides = [1, 1]} : vector<16x128xf32> to vector<1x128xf32>
    %103 = vector.shape_cast %102 : vector<1x128xf32> to vector<128xf32>
    %cst_33 = arith.constant dense<0.000000e+00> : vector<16xf32>
    %104 = vector.multi_reduction <add>, %99, %cst_33 [1] : vector<16x128xf32> to vector<16xf32>
    %105 = vector.shape_cast %104 : vector<16xf32> to vector<16x1xf32>
    %cst_34 = arith.constant 1.280000e+02 : f32
    %106 = vector.broadcast %cst_34 : f32 to vector<16x1xf32>
    %107 = arith.divf %105, %106 : vector<16x1xf32>
    %108 = vector.broadcast %107 : vector<16x1xf32> to vector<16x128xf32>
    %109 = arith.subf %99, %108 : vector<16x128xf32>
    %110 = arith.mulf %109, %109 : vector<16x128xf32>
    %cst_35 = arith.constant dense<0.000000e+00> : vector<16xf32>
    %111 = vector.multi_reduction <add>, %110, %cst_35 [1] : vector<16x128xf32> to vector<16xf32>
    %112 = vector.shape_cast %111 : vector<16xf32> to vector<16x1xf32>
    %cst_36 = arith.constant 1.280000e+02 : f32
    %113 = vector.broadcast %cst_36 : f32 to vector<16x1xf32>
    %114 = arith.divf %112, %113 : vector<16x1xf32>
    %115 = vector.broadcast %107 : vector<16x1xf32> to vector<16x128xf32>
    %116 = arith.subf %99, %115 : vector<16x128xf32>
    %cst_37 = arith.constant 9.99999993E-9 : f32
    %117 = vector.broadcast %cst_37 : f32 to vector<16x1xf32>
    %118 = arith.addf %114, %117 : vector<16x1xf32>
    %119 = math.rsqrt %118 : vector<16x1xf32>
    %120 = vector.broadcast %119 : vector<16x1xf32> to vector<16x128xf32>
    %121 = arith.mulf %116, %120 : vector<16x128xf32>
    %122 = vector.shape_cast %101 : vector<128xf32> to vector<1x128xf32>
    %123 = vector.broadcast %122 : vector<1x128xf32> to vector<16x128xf32>
    %124 = arith.mulf %121, %123 : vector<16x128xf32>
    %125 = vector.shape_cast %103 : vector<128xf32> to vector<1x128xf32>
    %126 = vector.broadcast %125 : vector<1x128xf32> to vector<16x128xf32>
    %127 = arith.addf %124, %126 : vector<16x128xf32>
    %128 = arith.truncf %127 : vector<16x128xf32> to vector<16x128xbf16>
    %c4 = arith.constant 4 : index
    %c0_38 = arith.constant 0 : index
    %c0_39 = arith.constant 0 : index
    %129 = vector.load %arg5[%c4, %c0_38, %c0_39] : memref<6x128x128xbf16, #tpu.memory_space<vmem>>, vector<1x128x128xbf16>
    %130 = vector.shape_cast %129 : vector<1x128x128xbf16> to vector<128x128xbf16>
    %cst_40 = arith.constant dense<0.000000e+00> : vector<16x128xf32>
    %131 = tpu.matmul %128, %130, %cst_40 {dimension_numbers = #tpu.dot_dimension_numbers<[1], [0], [0], [1], [0, 0, 1, 1], [], []>} : vector<16x128xbf16>, vector<128x128xbf16>, vector<16x128xf32> -> vector<16x128xf32>
    %132 = vector.extract_strided_slice %8 {offsets = [8, 0], sizes = [1, 128], strides = [1, 1]} : vector<16x128xf32> to vector<1x128xf32>
    %133 = vector.shape_cast %132 : vector<1x128xf32> to vector<128xf32>
    %134 = vector.shape_cast %133 : vector<128xf32> to vector<1x128xf32>
    %135 = vector.broadcast %134 : vector<1x128xf32> to vector<16x128xf32>
    %136 = arith.addf %131, %135 : vector<16x128xf32>
    %cst_41 = arith.constant 0.000000e+00 : f32
    %137 = vector.broadcast %cst_41 : f32 to vector<16x128xf32>
    %138 = arith.maximumf %136, %137 : vector<16x128xf32>
    %139 = arith.truncf %138 : vector<16x128xf32> to vector<16x128xbf16>
    %c5 = arith.constant 5 : index
    %c0_42 = arith.constant 0 : index
    %c0_43 = arith.constant 0 : index
    %140 = vector.load %arg5[%c5, %c0_42, %c0_43] : memref<6x128x128xbf16, #tpu.memory_space<vmem>>, vector<1x128x128xbf16>
    %141 = vector.shape_cast %140 : vector<1x128x128xbf16> to vector<128x128xbf16>
    %cst_44 = arith.constant dense<0.000000e+00> : vector<16x128xf32>
    %142 = tpu.matmul %139, %141, %cst_44 {dimension_numbers = #tpu.dot_dimension_numbers<[1], [0], [0], [1], [0, 0, 1, 1], [], []>} : vector<16x128xbf16>, vector<128x128xbf16>, vector<16x128xf32> -> vector<16x128xf32>
    %143 = vector.extract_strided_slice %8 {offsets = [9, 0], sizes = [1, 128], strides = [1, 1]} : vector<16x128xf32> to vector<1x128xf32>
    %144 = vector.shape_cast %143 : vector<1x128xf32> to vector<128xf32>
    %145 = vector.shape_cast %144 : vector<128xf32> to vector<1x128xf32>
    %146 = vector.broadcast %145 : vector<1x128xf32> to vector<16x128xf32>
    %147 = arith.addf %142, %146 : vector<16x128xf32>
    %148 = arith.addf %127, %147 : vector<16x128xf32>
    %149 = vector.broadcast %6 : vector<16x1xf32> to vector<16x128xf32>
    %150 = arith.mulf %148, %149 : vector<16x128xf32>
    %c1_i32 = arith.constant 1 : i32
    %151 = arith.cmpi eq, %arg1, %c1_i32 : i32
    %true = arith.constant true
    %152 = arith.xori %151, %true : i1
    %153 = arith.extui %152 : i1 to i32
    %c0_i32_45 = arith.constant 0 : i32
    %154 = arith.cmpi ne, %153, %c0_i32_45 : i32
    scf.if %154 {
      %157 = vector.shape_cast %150 : vector<16x128xf32> to vector<1x16x128xf32>
      %c0_47 = arith.constant 0 : index
      %c0_48 = arith.constant 0 : index
      %c0_49 = arith.constant 0 : index
      %158 = vector.load %arg8[%c0_47, %c0_48, %c0_49] : memref<1x16x128xf32, #tpu.memory_space<vmem>>, vector<1x16x128xf32>
      tpu.vector_store %arg8[%c0_47, %c0_48, %c0_49], %157 {strides = array<i32>} : memref<1x16x128xf32, #tpu.memory_space<vmem>>, vector<1x16x128xf32>,
    } else {
    }
    %155 = arith.extui %151 : i1 to i32
    %c0_i32_46 = arith.constant 0 : i32
    %156 = arith.cmpi ne, %155, %c0_i32_46 : i32
    scf.if %156 {
      %c0_47 = arith.constant 0 : index
      %c0_48 = arith.constant 0 : index
      %157 = vector.load %arg7[%c0_47, %c0_48] : memref<2x128xf32, #tpu.memory_space<vmem>>, vector<1x128xf32>
      %158 = vector.shape_cast %157 : vector<1x128xf32> to vector<128xf32>
      %c1_49 = arith.constant 1 : index
      %c0_50 = arith.constant 0 : index
      %159 = vector.load %arg7[%c1_49, %c0_50] : memref<2x128xf32, #tpu.memory_space<vmem>>, vector<1x128xf32>
      %160 = vector.shape_cast %159 : vector<1x128xf32> to vector<128xf32>
      %cst_51 = arith.constant dense<0.000000e+00> : vector<16xf32>
      %161 = vector.multi_reduction <add>, %150, %cst_51 [1] : vector<16x128xf32> to vector<16xf32>
      %162 = vector.shape_cast %161 : vector<16xf32> to vector<16x1xf32>
      %cst_52 = arith.constant 1.280000e+02 : f32
      %163 = vector.broadcast %cst_52 : f32 to vector<16x1xf32>
      %164 = arith.divf %162, %163 : vector<16x1xf32>
      %165 = vector.broadcast %164 : vector<16x1xf32> to vector<16x128xf32>
      %166 = arith.subf %150, %165 : vector<16x128xf32>
      %167 = arith.mulf %166, %166 : vector<16x128xf32>
      %cst_53 = arith.constant dense<0.000000e+00> : vector<16xf32>
      %168 = vector.multi_reduction <add>, %167, %cst_53 [1] : vector<16x128xf32> to vector<16xf32>
      %169 = vector.shape_cast %168 : vector<16xf32> to vector<16x1xf32>
      %cst_54 = arith.constant 1.280000e+02 : f32
      %170 = vector.broadcast %cst_54 : f32 to vector<16x1xf32>
      %171 = arith.divf %169, %170 : vector<16x1xf32>
      %172 = vector.broadcast %164 : vector<16x1xf32> to vector<16x128xf32>
      %173 = arith.subf %150, %172 : vector<16x128xf32>
      %cst_55 = arith.constant 9.99999993E-9 : f32
      %174 = vector.broadcast %cst_55 : f32 to vector<16x1xf32>
      %175 = arith.addf %171, %174 : vector<16x1xf32>
      %176 = math.rsqrt %175 : vector<16x1xf32>
      %177 = vector.broadcast %176 : vector<16x1xf32> to vector<16x128xf32>
      %178 = arith.mulf %173, %177 : vector<16x128xf32>
      %179 = vector.shape_cast %158 : vector<128xf32> to vector<1x128xf32>
      %180 = vector.broadcast %179 : vector<1x128xf32> to vector<16x128xf32>
      %181 = arith.mulf %178, %180 : vector<16x128xf32>
      %182 = vector.shape_cast %160 : vector<128xf32> to vector<1x128xf32>
      %183 = vector.broadcast %182 : vector<1x128xf32> to vector<16x128xf32>
      %184 = arith.addf %181, %183 : vector<16x128xf32>
      %185 = vector.shape_cast %184 : vector<16x128xf32> to vector<1x16x128xf32>
      %c0_56 = arith.constant 0 : index
      %c0_57 = arith.constant 0 : index
      %c0_58 = arith.constant 0 : index
      %186 = vector.load %arg8[%c0_56, %c0_57, %c0_58] : memref<1x16x128xf32, #tpu.memory_space<vmem>>, vector<1x16x128xf32>
      tpu.vector_store %arg8[%c0_56, %c0_57, %c0_58], %185 {strides = array<i32>} : memref<1x16x128xf32, #tpu.memory_space<vmem>>, vector<1x16x128xf32>,
    } else {
    }
    return
  }
  func.func @transform_0(%arg0: i32, %arg1: i32) -> (i32, i32) {
    %c0_i32 = arith.constant 0 : i32
    %c0_i32_0 = arith.constant 0 : i32
    %c0_i32_1 = arith.constant 0 : i32
    return %c0_i32, %c0_i32_0 : i32, i32
  }
  func.func @transform_1(%arg0: i32, %arg1: i32) -> (i32, i32, i32) {
    %c0_i32 = arith.constant 0 : i32
    %c0_i32_0 = arith.constant 0 : i32
    %c0_i32_1 = arith.constant 0 : i32
    return %arg0, %c0_i32, %c0_i32_0 : i32, i32, i32
  }
  func.func @transform_2(%arg0: i32, %arg1: i32) -> (i32, i32, i32) {
    %c0_i32 = arith.constant 0 : i32
    %c0_i32_0 = arith.constant 0 : i32
    %c0_i32_1 = arith.constant 0 : i32
    return %arg0, %c0_i32, %c0_i32_0 : i32, i32, i32
  }
  func.func @transform_3(%arg0: i32, %arg1: i32) -> (i32, i32, i32) {
    %c0_i32 = arith.constant 0 : i32
    %c0_i32_0 = arith.constant 0 : i32
    %c0_i32_1 = arith.constant 0 : i32
    return %arg1, %c0_i32, %c0_i32_0 : i32, i32, i32
  }
  func.func @transform_4(%arg0: i32, %arg1: i32) -> (i32, i32, i32) {
    %c0_i32 = arith.constant 0 : i32
    %c0_i32_0 = arith.constant 0 : i32
    %c0_i32_1 = arith.constant 0 : i32
    return %arg1, %c0_i32, %c0_i32_0 : i32, i32, i32
  }
  func.func @transform_5(%arg0: i32, %arg1: i32) -> (i32, i32) {
    %c0_i32 = arith.constant 0 : i32
    %c0_i32_0 = arith.constant 0 : i32
    %c0_i32_1 = arith.constant 0 : i32
    return %c0_i32, %c0_i32_0 : i32, i32
  }
  func.func @transform_6(%arg0: i32, %arg1: i32) -> (i32, i32, i32) {
    %c0_i32 = arith.constant 0 : i32
    %c0_i32_0 = arith.constant 0 : i32
    %c0_i32_1 = arith.constant 0 : i32
    return %arg0, %c0_i32, %c0_i32_0 : i32, i32, i32
  }
}

</mosaic_0001>

<bundles_post_ra>
// kernel: tpu_custom_call.1
= control target key start
LH: loop header
LB: loop body
LE: loop exit
PB: predicated region body
PF: predicated region fallthrough
CT: control target
= control target key end

     0   :  { %s2802_s0 = inlined_call_operand.hbm [shape: f32[16,16], index: 0, kind: input, shape index: {}]   ;;  %s2803_s1 = inlined_call_operand.vmem [shape: f32[2,16,128], index: 1, kind: input, shape index: {}]   ;;  %s2804_s2 = inlined_call_operand.vmem [shape: f32[2,16,1], index: 2, kind: input, shape index: {}]   ;;  %s2805_s3 = inlined_call_operand.hbm [shape: bf16[12,128,128], index: 3, kind: input, shape index: {}]   ;;  %s2806_s4 = inlined_call_operand.hbm [shape: f32[2,16,128], index: 4, kind: input, shape index: {}]   ;;  %s2807_s5 = inlined_call_operand.vmem [shape: f32[2,128], index: 5, kind: input, shape index: {}]   ;;  %s2808_s6 = inlined_call_operand.hbm [shape: f32[2,16,128], index: 6, kind: output, shape index: {}]  }
   0x1   :  { %2825 = sst [smem:[#allocation22_spill]] %s2805_s3 }
   0x2   :  { %11 = vsyncpa [#allocation3], 0 }
   0x3   :  { %12 = vsyncpa [#allocation6], 0 }
   0x4   :  { %14 = vsyncpa [#allocation6 + $0x1], 0 }
   0x5   :  { %15 = vsyncpa [#allocation4], 0 }
   0x6   :  { %17 = vsyncpa [#allocation4 + $0x1], 0  ;;  %s2281_s21 = smov 0   ;;  %s2283_s22 = smov 0  }
   0x7   :  { %s2285_s23 = smov 0   ;;  %s2287_s24 = smov 0  }
   0x8   :  { %s2289_s25 = smov 0   ;;  %s2291_s26 = smov 0  }
   0x9   :  { %s2293_s27 = smov 0   ;;  %s2295_s28 = smov 0  }
   0xa   :  { %s2297_s29 = smov 0   ;;  %s2299_s30 = smov 0  }
   0xb   :  { %s2301_s7 = smov 0  }
   0xc LB: > { %2826 = sst [smem:[#allocation12_spill]] %s2191_s21  ;;  %s32_s8 = sadd.s32 1, %s2223_s29  ;;  %s2231_s7 = sphi %s2301_s7, %s23_s7   ;;  %s2227_s30 = sphi %s2299_s30, %s2863_s30   ;;  %s2223_s29 = sphi %s2297_s29, %s2862_s29   ;;  %s2219_s28 = sphi %s2295_s28, %s2861_s28   ;;  %s2215_s27 = sphi %s2293_s27, %s2860_s27   ;;  %s2211_s26 = sphi %s2291_s26, %s2859_s26   ;;  %s2207_s25 = sphi %s2289_s25, %s2867_s25   ;;  %s2203_s24 = sphi %s2287_s24, %s2866_s24   ;;  %s2199_s23 = sphi %s2285_s23, %s2857_s23   ;;  %s2195_s22 = sphi %s2283_s22, %s2865_s22   ;;  %s2191_s21 = sphi %s2281_s21, %s2864_s21  }
   0xd   : > { %2827 = sst [smem:[#allocation13_spill]] %s2199_s23  ;;  %s35_s9 = sadd.s32 1, %s2227_s30 }
   0xe   : > { %2828 = sst [smem:[#allocation14_spill]] %s2211_s26  ;;  %p33_p0 = scmp.ge.s32.totalorder %s32_s8, 2 }
   0xf   : > { %2829 = sst [smem:[#allocation15_spill]] %s2223_s29  ;;  %s115_s10 = sadd.s32 1, %s2211_s26 }
  0x10   : > { %2830 = sst [smem:[#allocation16_spill]] %s2227_s30  ;;  %p122_p1 = scmp.ne.s32.totalorder %s2211_s26, %s2207_s25 }
  0x11   : > { %p123_p2 = scmp.eq.s32.totalorder %s2231_s7, 0  ;;  %s2869_s8 = smov (%p33_p0, %s32_s8), 0 }
  0x12   : > { %2831 = sst [smem:[#allocation17_spill]] %s2869_s8  ;;  %s2871_s9 = smov (!%p33_p0, %s35_s9), %s2227_s30 }
  0x13   : > { %s112_s11 = ssub.s32 %s2223_s29, %s2869_s8  ;;  %p124_p3 = por %p123_p2, %p122_p1 }
  0x14   : > { %p37_p4 = scmp.ge.s32.totalorder %s2871_s9, 2  ;;  %p113_p5 = scmp.eq.s32.totalorder %s112_s11, 0 }
  0x15   : > { %p1846_p6 = scmp.lt.s32.totalorder %s2231_s7, 4  ;;  %s257_s13 = sand.u32 1, %s2231_s7  }
  0x16   : > { %s2873_s9 = smov (%p37_p4, %s2871_s9), 0  ;;  %s2811_s15 = sand.u32 1, %s2211_s26  }
  0x17   : > { %2832 = sst [smem:[#allocation18_spill]] %s2873_s9  ;;  %s185_s14 = ssub.s32 %s2227_s30, %s2873_s9 }
  0x18   : > { %s2351_s12 = scalar_select %p113_p5, %s2211_s26, %s115_s10  }
  0x19   : > { %s1627_s16 = smul.u32 6144, %s2223_s29  ;;  %p2360_p7 = pnand %p1846_p6, %p124_p3 }
  0x1a   : > { %2833 = sst [smem:[#allocation19_spill]] %s2351_s12  ;;  %s1818_s17 = smul.u32 384, %s2811_s15 }
  0x1b   : > { %s2834_s18 = scalar_select %p2360_p7, 1, 0 }
  0x1c   : > { %s2835_s3 = sld [smem:[#allocation22_spill]]  ;;  %s261_s10 = scalar_lea.vmem [#allocation5], %s1818_s17 }
  0x1d   : > { %s269_s9 = sshll.u32 %s261_s10, 4  ;;  %p2369_p8 = scmp.eq.s32.totalorder %s185_s14, 0  ;;  %s2373_s9 = int_to_ptr.vmem [resolvable:$true] %s269_s9 }
  0x1e   : > { %s2375_s15 = scalar_lea.sflag [#allocation6], %s257_s13  ;;  %p2819_p10 = pneg %p2360_p7 }
  0x22   : > { %s2367_s11 = scalar_lea.hbm %s2835_s3, %s1627_s16  ;;  %s2022_s17 = scalar_lea.hbm %s2835_s3, 12288 }
  0x23   : > { %s2017_s30 = scalar_lea.hbm %s2367_s11, 6144  ;;  %p2023_p13 = scmp.lt.u32.totalorder %s2367_s11, %s2835_s3 }
  0x24   : > { %p2018_p9 = scmp.ne.s32.totalorder %s2367_s11, %s2017_s30  ;;  %p2024_p0 = scmp.lt.u32.totalorder %s2022_s17, %s2017_s30 }
  0x25   : > { %p2026_p2 = scmp.lt.u32.totalorder %s2017_s30, %s2367_s11 }
  0x26   : > { %p2020_p11 = pnand %p2819_p10, %p2018_p9  ;;  %p2025_p1 = por %p2024_p0, %p2023_p13 }
  0x28   : > { %p2021_p12 = pneg %p2020_p11  ;;  %p2027_p3 = por %p2026_p2, %p2025_p1 }
  0x2a   : > { %p2028_p4 = pnand %p2027_p3, %p2021_p12 }
  0x2c   : > { %2031 = shalt.err (!%p2028_p4)
}
  0x2d   : > { %s2032_s13 = scalar_lea.vmem %s2373_s9, 6144  ;;  %s2233_s10 = smov [#allocation5]  }
  0x2e   : > { %p2033_p5 = scmp.ne.s32.totalorder %s2373_s9, %s2032_s13  ;;  %s2037_s16 = sshll.u32 %s2233_s10, 4  ;;  %s2038_s16 = int_to_ptr.vmem [resolvable:$false] %s2037_s16 }
  0x2f   : > { %s2039_s19 = scalar_lea.vmem %s2038_s16, 12288  ;;  %p2040_p11 = scmp.lt.s32.totalorder %s2373_s9, %s2038_s16 }
  0x30   : > { %p2035_p6 = pnand %p2033_p5, %p2819_p10  ;;  %p2041_p13 = scmp.lt.s32.totalorder %s2039_s19, %s2032_s13 }
  0x32   : > { %p2036_p9 = pneg %p2035_p6  ;;  %p2042_p0 = por %p2041_p13, %p2040_p11 }
  0x34   : > { %p2043_p1 = pnand %p2042_p0, %p2036_p9 }
  0x36   : > { %2046 = shalt.err (!%p2043_p1)
}
  0x37   : > { %s2234_s30 = smov 64   ;;  %s2235_s17 = smov 4  }
  0x38   : > { %1837 = dma.hbm_to_vmem [thread:$0]  (!%p2360_p7), %s2367_s11, 6144, %s2373_s9, %s2375_s15, %s2234_s30, %s2234_s30, %s2235_s17  }
  0x39   : > { %s2837_s14 = sand.u32 1, %s2211_s26   ;;  %s2406_s13 = sadd.s32 4294967295, %s2231_s7  }
  0x3a   : > { %s1471_s20 = sshll.u32 %s2837_s14, 4  ;;  %s1465_s10 = sadd.s32 4294967294, %s2231_s7  }
  0x3b   : > { %p128_p12 = scmp.ne.s32.totalorder %s2207_s25, %s2203_s24  ;;  %p2818_p2 = scmp.eq.s32.totalorder %s2406_s13, 0 }
  0x3c   : > { %s188_s16 = sadd.s32 1, %s2199_s23  ;;  %p198_p4 = scmp.ne.s32.totalorder %s2199_s23, %s2195_s22 }
  0x3d   : > { %s2416_s19 = scalar_select %p2369_p8, %s2199_s23, %s188_s16  }
  0x3e   : > { %p2420_p3 = por %p2818_p2, %p128_p12  ;;  %p199_p5 = scmp.eq.s32.totalorder %s2406_s13, 3 }
  0x3f   : > { %2838 = sst [smem:[#allocation20_spill]] %s2416_s19  ;;  %p204_p6 = scmp.ne.s32.totalorder %s2195_s22, %s2191_s21 }
  0x40   : > { %s2839_s3 = scalar_select %p2420_p3, 1, 0 }
  0x41   : > { %p205_p9 = scmp.eq.s32.totalorder %s1465_s10, 3  ;;  %p1466_p11 = scmp.ge.s32.totalorder %s2231_s7, 1 }
  0x42   : > { %p2430_p13 = por %p199_p5, %p198_p4  ;;  %p212_p0 = scmp.lt.s32.totalorder %s2231_s7, 5 }
  0x43   : > { %p2435_p1 = por %p205_p9, %p204_p6  ;;  %s2236_s11 = smov [#allocation2]  }
  0x44   : > { %s2840_s9 = scalar_select %p2430_p13, 1, 0 }
  0x45   : > { %s2841_s24 = scalar_select %p2435_p1, 1, 0 }
  0x46   : > { %p2439_p8 = pnand %p1466_p11, %p212_p0  ;;  %s224_s30 = sshll.u32 %s2236_s11, 4  ;;  %s2445_s30 = int_to_ptr.vmem [resolvable:$true] %s224_s30 }
  0x47   : > { %2842 = sst [smem:[#allocation21_spill]] %s2841_s24  ;;  %s1623_s17 = sshll.u32 %s2223_s29, 8 }
  0x48   : > { %s2843_s8 = scalar_select %p2439_p8, 1, 0 }
  0x49   : > { %p1830_p12 = pneg %p2439_p8  ;;  %s2457_s12 = scalar_lea.hbm %s2806_s4, %s1623_s17 }
  0x4a   : > { %s283_s26 = scalar_lea.vmem [#allocation7], %s1471_s20  ;;  %s2047_s24 = scalar_lea.hbm %s2802_s0, 256 }
  0x4b   : > { %p2450_p4 = pnand %p1830_p12, %p2818_p2  ;;  %s290_s19 = sshll.u32 %s283_s26, 4  ;;  %s2459_s19 = int_to_ptr.vmem [resolvable:$true] %s290_s19 }
  0x4c   : > { %p2048_p5 = scmp.ne.s32.totalorder %s2802_s0, %s2047_s24  ;;  %p2054_p0 = scmp.lt.u32.totalorder %s2047_s24, %s2802_s0 }
  0x4d   : > { %p2049_p6 = pneg %p2450_p4 }
  0x4f   : > { %p2050_p9 = pnand %p2049_p6, %p2048_p5 }
  0x51   : > { %p2051_p11 = pneg %p2050_p9 }
  0x53   : > { %p2056_p12 = pnand %p2054_p0, %p2051_p11 }
  0x55   : > { %2059 = shalt.err (!%p2056_p12)
}
  0x56   : > { %s2060_s26 = scalar_lea.vmem %s2445_s30, 256  ;;  %p2068_p13 = scmp.lt.s32.totalorder %s2445_s30, %s2445_s30 }
  0x57   : > { %p2061_p2 = scmp.ne.s32.totalorder %s2445_s30, %s2060_s26  ;;  %p2069_p3 = scmp.lt.s32.totalorder %s2060_s26, %s2060_s26 }
  0x59   : > { %p2063_p10 = pnand %p2061_p2, %p2049_p6  ;;  %p2070_p8 = por %p2069_p3, %p2068_p13 }
  0x5b   : > { %p2064_p1 = pneg %p2063_p10 }
  0x5d   : > { %p2071_p7 = pnand %p2070_p8, %p2064_p1 }
  0x5f   : > { %2074 = shalt.err (!%p2071_p7)
}
  0x60   : > { %s2237_s21 = smov 128   ;;  %s2238_s23 = smov 8  }
  0x61   : > { %1833 = dma.hbm_to_vmem [thread:$0]  (!%p2450_p4), %s2802_s0, 256, %s2445_s30, [#allocation3], %s2237_s21, %s2237_s21, %s2238_s23  }
  0x62   : > { %s2075_s24 = scalar_lea.hbm %s2457_s12, 256  ;;  %p2845_p7 = scmp.ne.s32.totalorder %s2834_s18, 0 }
  0x63   : > { %p2076_p10 = scmp.ne.s32.totalorder %s2457_s12, %s2075_s24  ;;  %s2080_s10 = scalar_lea.hbm %s2806_s4, 512 }
  0x64   : > { %p2846_p2 = pneg %p2845_p7  ;;  %p2081_p1 = scmp.lt.u32.totalorder %s2457_s12, %s2806_s4 }
  0x65   : > { %p2082_p8 = scmp.lt.u32.totalorder %s2080_s10, %s2075_s24  ;;  %p2084_p6 = scmp.lt.u32.totalorder %s2075_s24, %s2457_s12 }
  0x66   : > { %p2078_p3 = pnand %p2076_p10, %p2846_p2 }
  0x67   : > { %p2083_p5 = por %p2082_p8, %p2081_p1 }
  0x68   : > { %p2079_p13 = pneg %p2078_p3 }
  0x69   : > { %p2085_p9 = por %p2084_p6, %p2083_p5 }
  0x6b   : > { %p2086_p11 = pnand %p2085_p9, %p2079_p13 }
  0x6d   : > { %2089 = shalt.err (!%p2086_p11)
}
  0x6e   : > { %s2090_s30 = scalar_lea.vmem %s2459_s19, 256  ;;  %p2847_p0 = pmov %p2846_p2 }
  0x6f   : > { %p2091_p4 = scmp.ne.s32.totalorder %s2459_s19, %s2090_s30  ;;  %s2239_s14 = smov [#allocation7]  }
  0x70   : > { %s2095_s29 = sshll.u32 %s2239_s14, 4  ;;  %s2096_s29 = int_to_ptr.vmem [resolvable:$false] %s2095_s29 }
  0x71   : > { %p2093_p12 = pnand %p2091_p4, %p2847_p0  ;;  %s2097_s20 = scalar_lea.vmem %s2096_s29, 512 }
  0x72   : > { %p2098_p2 = scmp.lt.s32.totalorder %s2459_s19, %s2096_s29  ;;  %p2099_p3 = scmp.lt.s32.totalorder %s2097_s20, %s2090_s30 }
  0x73   : > { %p2094_p10 = pneg %p2093_p12 }
  0x74   : > { %p2100_p1 = por %p2099_p3, %p2098_p2 }
  0x76   : > { %p2101_p8 = pnand %p2100_p1, %p2094_p10 }
  0x78   : > { %2104 = shalt.err (!%p2101_p8)
}
  0x79   : > { %1840 = dma.hbm_to_vmem [thread:$0]  (!%p2845_p7), %s2457_s12, 256, %s2459_s19, %s2375_s15, %s2237_s21, %s2237_s21, %s2238_s23  }
  0x7a   : > { %p2848_p13 = scmp.ne.s32.totalorder %s2843_s8, 0 }
  0x7b   : > { %p2849_p5 = scmp.eq.s32.totalorder (!%p2848_p13), %s2406_s13, 0 }
  0x7c   : > { %302 = sbr.rel (%p2848_p13) target bundleno = 2757 (0xac5), region = 44 }
  0x83   : > { %2178 = dma.done.wait (%p2849_p5), [#allocation3], 256   ;;  %p2850_p6 = pmov %p2849_p5 }
  0x84   : > { %s308_s18 = sand.u32 1, %s2406_s13   ;;  %s310_s24 = sand.u32 1, %s2207_s25  }
  0x85   : > { %2180 = vsyncadd (%p2850_p6), [#allocation3], 4294967040  ;;  %s1819_s17 = smul.u32 384, %s310_s24  ;;  %s309_s11 = scalar_lea.sflag [#allocation6], %s308_s18 }
  0x86   : > { %p2851_p9 = scmp.ne.s32.totalorder %s2839_s3, 0 }
  0x87   : > { %s2520_s10 = scalar_lea.vmem [#allocation5], %s1819_s17 }
  0x88   : > { %2182 = dma.done.wait (%p2851_p9), %s309_s11, 6400  }
  0x89   : > { %2184 = vsyncadd (%p2851_p9), %s309_s11, 4294960896  ;;  %s2526_s12 = sshll.u32 %s310_s24, 4  ;;  %s362_s15 = sand.u32 1, %s2195_s22  }
  0x8a   : > { %s1477_s13 = sshll.u32 %s362_s15, 4  ;;  %p365_p7 = scmp.lt.s32.totalorder %s2219_s28, 1 }
  0x8b   : > { %s321_s14 = scalar_lea.vmem [#allocation7], %s2526_s12  ;;  %s2542_s29 = scalar_lea.vmem [#allocation8], %s1477_s13 }
  0x8c   : > { %s366_s19 = scalar_select %p365_p7, %s2219_s28, 1 }
  0x8d   : > { %p1482_p11 = scmp.ne.s32.totalorder %s2215_s27, 0 }
  0x8e   : > { %s1624_s8 = sshll.u32 %s366_s19, 4 }
  0x8f   : > { %s369_s16 = scalar_lea.vmem %s2803_s1, %s1624_s8  ;;  %s2539_s30 = scalar_lea.vmem %s2804_s2, %s1624_s8 }
  0x90   : > { %380 = sbr.rel (%p1482_p11) target bundleno = 151 (0x97), region = 60  ;;  %v381_v0 = vld [vmem:[%s369_s16] sm:$0xff] (!%p1482_p11)  ;;  %v382_v1 = vld [vmem:[%s369_s16 + $0x8] sm:$0xff] (!%p1482_p11) }
  0x91   : > { %383 = vst [vmem:[%s2542_s29] sm:$0xff] (!%p1482_p11), %v381_v0  ;;  %384 = vst [vmem:[%s2542_s29 + $0x8] sm:$0xff] (!%p1482_p11), %v382_v1 }
  0x97 PF: > { %v1949_v4 = vld [vmem:[%s2520_s10 + $0x40] sm:$0xff]   ;;  %v2240_v5 = vmov 0.0   ;;  %v1950_v6 = vld [vmem:[%s2520_s10 + $0x48] sm:$0xff]   ;;  %v1951_v8 = vld [vmem:[%s2520_s10 + $0x50] sm:$0xff]   ;;  %vm2241_vm0 = vmmov 0   ;;  %v414_v34 = vlaneseq  ;;  %vm807_vm1 = vcmask 130048  }
  0x98   : > { %v385_v2 = vld [vmem:[%s2542_s29] sm:$0xff]  ;;  %v386_v3 = vld [vmem:[%s2542_s29 + $0x8] sm:$0xff]  ;;  %1706 = vmatprep.subr.bf16.mxu1 %v2240_v5  ;;  %1686 = vmatprep.subr.bf16.mxu0 %v2240_v5  ;;  %p1612_p4 = scmp.eq.s32.totalorder %s2215_s27, 1 }
  0x99   : > { %391 = vadd.xlane.f32.xlu0 %v385_v2  ;;  %v1952_v7 = vld [vmem:[%s2520_s10] sm:$0xff]   ;;  %1707 = vmatpush3.bf16.msra.mxu1 %v1949_v4  ;;  %v1953_v9 = vld [vmem:[%s2520_s10 + $0x58] sm:$0xff]   ;;  %v1954_v18 = vld [vmem:[%s2520_s10 + $0x8] sm:$0xff]   ;;  %v426_v27 = vpack.c.bf16 %v386_v3, %v385_v2  ;;  %v2589_v37 = vshrl.u32 %v414_v34, 7 }
  0x9a   : > { %1708 = vmatprep.subr.bf16.mxu1 %v2240_v5  ;;  %1687 = vmatpush3.bf16.msra.mxu0 %v1952_v7  ;;  %v1955_v19 = vld [vmem:[%s2520_s10 + $0x60] sm:$0xff]   ;;  %v1956_v20 = vld [vmem:[%s2520_s10 + $0x10] sm:$0xff]   ;;  %v1957_v21 = vld [vmem:[%s2520_s10 + $0x68] sm:$0xff]  }
  0x9b   : > { %1688 = vmatprep.subr.bf16.mxu0 %v2240_v5  ;;  %v1958_v22 = vld [vmem:[%s2520_s10 + $0x18] sm:$0xff]   ;;  %v1959_v23 = vld [vmem:[%s2520_s10 + $0x70] sm:$0xff]   ;;  %v1960_v24 = vld [vmem:[%s2520_s10 + $0x20] sm:$0xff]   ;;  %1722 = vmatprep.mubr.msk.bf16.mxu1 %vm2241_vm0, %v2240_v5  ;;  %v416_v38 = vsub.s32 0, %v2589_v37  ;;  %v422_v43 = vsub.s32 1, %v2589_v37  ;;  %v556_v60 = vsub.s32 3, %v2589_v37 }
  0x9c   : > { %v1961_v25 = vld [vmem:[%s2520_s10 + $0x78] sm:$0xff]   ;;  %1702 = vmatprep.mubr.msk.bf16.mxu0 %vm2241_vm0, %v2240_v5  ;;  %v1962_v26 = vld [vmem:[%s2520_s10 + $0x28] sm:$0xff]   ;;  %v1963_v28 = vld [vmem:[%s2520_s10 + $0x30] sm:$0xff]  }
  0x9d   : > { %393 = vadd.xlane.f32.xlu0 %v386_v3  ;;  %1709 = vmatpush3.bf16.msra.mxu1 %v1950_v6  ;;  %v1964_v29 = vld [vmem:[%s2520_s10 + $0x38] sm:$0xff]   ;;  %v2594_v39 = vld [vmem:[%s321_s14] sm:$0xff]  ;;  %v1966_v53 = vld [vmem:[%s2520_s10 + $0x88] sm:$0xff]   ;;  %v446_v6 = vsub.s32 2, %v2589_v37 }
  0x9e   : > { %1710 = vmatprep.subr.bf16.mxu1 %v2240_v5  ;;  %1689 = vmatpush3.bf16.msra.mxu0 %v1954_v18  ;;  %v417_v42 = vrot.slane %v2594_v39, %v416_v38  ;;  %v423_v47 = vrot.slane %v2594_v39, %v422_v43  ;;  %v1965_v51 = vld [vmem:[%s2520_s10 + $0x80] sm:$0xff]   ;;  %v1967_v54 = vld [vmem:[%s2520_s10 + $0x90] sm:$0xff]   ;;  %v1968_v55 = vld [vmem:[%s2520_s10 + $0x98] sm:$0xff]   ;;  %v557_v61 = vrot.slane %v2594_v39, %v556_v60 }
  0x9f   : > { %1690 = vmatprep.subr.bf16.mxu0 %v2240_v5  ;;  %v1969_v56 = vld [vmem:[%s2520_s10 + $0xa0] sm:$0xff]   ;;  %v1970_v57 = vld [vmem:[%s2520_s10 + $0xa8] sm:$0xff]   ;;  %v1971_v58 = vld [vmem:[%s2520_s10 + $0xb0] sm:$0xff]   ;;  %v447_v7 = vrot.slane %v2594_v39, %v446_v6  ;;  %v2242_v6 = vmov 0  }
  0xa0   : > { %v1972_v59 = vld [vmem:[%s2520_s10 + $0xb8] sm:$0xff]   ;;  %v1974_v60 = vld [vmem:[%s2520_s10 + $0xc8] sm:$0xff]   ;;  %1947 = vset.pattern.permute.xlu0 %v2242_v6  ;;  %1948 = vset.pattern.permute.xlu1 %v2242_v6 }
  0xa1   : > { %1711 = vmatpush3.bf16.msra.mxu1 %v1951_v8 }
  0xa2   : > { %1712 = vmatprep.subr.bf16.mxu1 %v2240_v5  ;;  %1691 = vmatpush3.bf16.msra.mxu0 %v1956_v20 }
  0xa3   : > { %1692 = vmatprep.subr.bf16.mxu0 %v2240_v5 }
  0xa5   : > { %1713 = vmatpush3.bf16.msra.mxu1 %v1953_v9 }
  0xa6   : > { %1714 = vmatprep.subr.bf16.mxu1 %v2240_v5  ;;  %1693 = vmatpush3.bf16.msra.mxu0 %v1958_v22 }
  0xa7   : > { %1694 = vmatprep.subr.bf16.mxu0 %v2240_v5 }
  0xa9   : > { %1715 = vmatpush3.bf16.msra.mxu1 %v1955_v19 }
  0xaa   : > { %1716 = vmatprep.subr.bf16.mxu1 %v2240_v5  ;;  %1695 = vmatpush3.bf16.msra.mxu0 %v1960_v24 }
  0xab   : > { %1696 = vmatprep.subr.bf16.mxu0 %v2240_v5 }
  0xad   : > { %1717 = vmatpush3.bf16.msra.mxu1 %v1957_v21 }
  0xae   : > { %1718 = vmatprep.subr.bf16.mxu1 %v2240_v5  ;;  %1697 = vmatpush3.bf16.msra.mxu0 %v1962_v26 }
  0xaf   : > { %1698 = vmatprep.subr.bf16.mxu0 %v2240_v5 }
  0xb1   : > { %1719 = vmatpush3.bf16.msra.mxu1 %v1959_v23 }
  0xb2   : > { %1720 = vmatprep.subr.bf16.mxu1 %v2240_v5  ;;  %1699 = vmatpush3.bf16.msra.mxu0 %v1963_v28 }
  0xb3   : > { %1700 = vmatprep.subr.bf16.mxu0 %v2240_v5 }
  0xb5   : > { %1721 = vmatpush3.bf16.msra.mxu1 %v1961_v25  ;;  %v803_v25 = vld [vmem:[#allocation2] sm:$0xff] }
  0xb6   : > { %1752 = vmatprep.subr.bf16.mxu1 %v2240_v5  ;;  %1701 = vmatpush3.bf16.msra.mxu0 %v1964_v29  ;;  %v804_v29 = vld [vmem:[#allocation2 + $0x8] sm:$0xff] }
  0xb7   : > { %1726 = vmatprep.subr.bf16.mxu0 %v2240_v5 }
  0xb8   : > { %1723 = vmatmul.mubr.bf16.vlgmr.msra.gmra.mrb[0].mxu1 %v426_v27 }
  0xb9   : > { %1754 = vmatprep.mubr.msk.bf16.mxu1 %vm2241_vm0, %v2240_v5 }
 0x126   : > { %v392_v10 = vpop.xlane.xlu0 %391 }
 0x127   : > { %v396_v11 = vmul.f32 0.0078125, %v392_v10 }
 0x129   : > { %v398_v12 = vsub.f32 %v385_v2, %v396_v11 }
 0x12a   : > { %v394_v13 = vpop.xlane.xlu0 %393 }
 0x12b   : > { %v397_v14 = vmul.f32 0.0078125, %v394_v13  ;;  %v400_v15 = vmul.f32 %v398_v12, %v398_v12 }
 0x12d   : > { %v399_v16 = vsub.f32 %v386_v3, %v397_v14  ;;  %402 = vadd.xlane.f32.xlu1 %v400_v15  ;;  %v666_v15 = vsub.s32 4, %v2589_v37 }
 0x12f   : > { %v401_v17 = vmul.f32 %v399_v16, %v399_v16 }
 0x131   : > { %404 = vadd.xlane.f32.xlu1 %v401_v17 }
 0x18b   : > { %v640_v62 = vpop.f32.mrb[0].mxu1 }
 0x18c   : > { %v641_v63 = vadd.f32 %v640_v62, %v557_v61  ;;  %v1724_v0 = vpop.f32.mrb[1].mxu1  ;;  %v1976_v62 = vld [vmem:[%s2520_s10 + $0xd8] sm:$0xff]  }
 0x18d   : > { %v643_v1 = vpop.f32.mrb[2].mxu1  ;;  %v1978_v0 = vld [vmem:[%s2520_s10 + $0xe8] sm:$0xff]  }
 0x18e   : > { %v644_v2 = vadd.f32 %v643_v1, %v557_v61  ;;  %v1725_v3 = vpop.f32.mrb[3].mxu1  ;;  %v1975_v61 = vld [vmem:[%s2520_s10 + $0xd0] sm:$0xff]  }
 0x18f   : > { %v1979_v1 = vld [vmem:[%s2520_s10 + $0xf0] sm:$0xff]  }
 0x190   : > { %v758_v4 = vpack.c.bf16 %v644_v2, %v641_v63  ;;  %v1977_v63 = vld [vmem:[%s2520_s10 + $0xe0] sm:$0xff]   ;;  %v1980_v2 = vld [vmem:[%s2520_s10 + $0xf8] sm:$0xff]   ;;  %v387_v3 = vld [vmem:[%s2539_s30] sm:$0xff] }
 0x1ba   : > { %v403_v30 = vpop.xlane.xlu1 %402 }
 0x1bb   : > { %v406_v31 = vmul.f32 0.0078125, %v403_v30 }
 0x1bd   : > { %v408_v32 = vadd.f32 1e-08, %v406_v31 }
 0x1be   : > { %v405_v33 = vpop.xlane.xlu1 %404 }
 0x1bf   : > { %1997 = vrsqrt.f32 %v408_v32  ;;  %v407_v35 = vmul.f32 0.0078125, %v405_v33 }
 0x1c1   : > { %v409_v36 = vadd.f32 1e-08, %v407_v35 }
 0x1c3   : > { %1999 = vrsqrt.f32 %v409_v36 }
 0x1c9   : > { %v1998_v40 = vpop.eup %1997 }
 0x1ca   : > { %v412_v41 = vmul.f32 %v1998_v40, %v398_v12 }
 0x1cc   : > { %v418_v46 = vmul.f32 %v417_v42, %v412_v41 }
 0x1cd   : > { %v2000_v44 = vpop.eup %1999 }
 0x1ce   : > { %v413_v45 = vmul.f32 %v2000_v44, %v399_v16  ;;  %v2603_v49 = vadd.f32 %v423_v47, %v418_v46  ;;  %v667_v16 = vrot.slane %v2594_v39, %v666_v15 }
 0x1d0   : > { %v419_v48 = vmul.f32 %v417_v42, %v413_v45 }
 0x1d2   : > { %v2605_v50 = vadd.f32 %v423_v47, %v419_v48 }
 0x1d4   : > { %v427_v52 = vpack.c.bf16 %v2605_v50, %v2603_v49 }
 0x1d6   : > { %1703 = vmatmul.mubr.bf16.vlgmr.msra.gmra.mrb[0].mxu0 %v427_v52 }
 0x1d7   : > { %1727 = vmatpush3.bf16.msra.mxu0 %v1965_v51  ;;  %1742 = vmatprep.mubr.msk.bf16.mxu0 %vm2241_vm0, %v2240_v5 }
 0x1d8   : > { %1728 = vmatprep.subr.bf16.mxu0 %v2240_v5 }
 0x1db   : > { %1729 = vmatpush3.bf16.msra.mxu0 %v1966_v53 }
 0x1dc   : > { %1730 = vmatprep.subr.bf16.mxu0 %v2240_v5 }
 0x1df   : > { %1731 = vmatpush3.bf16.msra.mxu0 %v1967_v54 }
 0x1e0   : > { %1732 = vmatprep.subr.bf16.mxu0 %v2240_v5 }
 0x1e3   : > { %1733 = vmatpush3.bf16.msra.mxu0 %v1968_v55 }
 0x1e4   : > { %1734 = vmatprep.subr.bf16.mxu0 %v2240_v5 }
 0x1e7   : > { %1735 = vmatpush3.bf16.msra.mxu0 %v1969_v56 }
 0x1e8   : > { %1736 = vmatprep.subr.bf16.mxu0 %v2240_v5 }
 0x1eb   : > { %1737 = vmatpush3.bf16.msra.mxu0 %v1970_v57 }
 0x1ec   : > { %1738 = vmatprep.subr.bf16.mxu0 %v2240_v5 }
 0x1ef   : > { %1739 = vmatpush3.bf16.msra.mxu0 %v1971_v58  ;;  %v1973_v58 = vld [vmem:[%s2520_s10 + $0xc0] sm:$0xff]  }
 0x1f0   : > { %1740 = vmatprep.subr.bf16.mxu0 %v2240_v5 }
 0x1f3   : > { %1741 = vmatpush3.bf16.msra.mxu0 %v1972_v59 }
 0x1f4   : > { %1746 = vmatprep.subr.bf16.mxu0 %v2240_v5 }
 0x1f6   : > { %1743 = vmatmul.mubr.bf16.vlgmr.msra.gmra.mrb[4].mxu0 %v426_v27 }
 0x1f7   : > { %1748 = vmatprep.mubr.msk.bf16.mxu0 %vm2241_vm0, %v2240_v5 }
 0x1fc   : > { %1747 = vmatpush3.bf16.xpose.msra.mxu0 %v758_v4  ;;  %v388_v4 = vld [vmem:[%s2539_s30 + $0x8] sm:$0xff] }
 0x1fd   : > { %1778 = vmatprep.subr.bf16.mxu0 %v2240_v5 }
 0x2a9   : > { %v530_v8 = vpop.f32.mrb[0].mxu0 }
 0x2aa   : > { %v1704_v9 = vpop.f32.mrb[1].mxu0  ;;  %v531_v11 = vadd.f32 %v530_v8, %v447_v7 }
 0x2ab   : > { %v533_v10 = vpop.f32.mrb[2].mxu0 }
 0x2ac   : > { %v534_v12 = vadd.f32 %v533_v10, %v447_v7  ;;  %v1705_v13 = vpop.f32.mrb[3].mxu0 }
 0x2ae   : > { %v757_v14 = vpack.c.bf16 %v534_v12, %v531_v11  ;;  %v895_v12 = vsub.s32 5, %v2589_v37 }
 0x2b0   : > { %1749 = vmatmul.mubr.bf16.vlgmr.msra.gmra.mrb[8].mxu0 %v757_v14  ;;  %v896_v13 = vrot.slane %v2594_v39, %v895_v12 }
 0x2b1   : > { %1794 = vmatprep.mubr.msk.bf16.mxu0 %vm2241_vm0, %v2240_v5 }
 0x2c9   : > { %v750_v17 = vpop.f32.mrb[4].mxu0 }
 0x2ca   : > { %v751_v18 = vadd.f32 %v750_v17, %v667_v16  ;;  %v1744_v19 = vpop.f32.mrb[5].mxu0 }
 0x2cb   : > { %v753_v20 = vpop.f32.mrb[6].mxu0 }
 0x2cc   : > { %v754_v21 = vadd.f32 %v753_v20, %v667_v16  ;;  %v1745_v22 = vpop.f32.mrb[7].mxu0 }
 0x2ce   : > { %v759_v23 = vpack.c.bf16 %v754_v21, %v751_v18 }
 0x2d0   : > { %1753 = vmatpush3.bf16.msra.mxu1 %v759_v23 }
 0x2d1   : > { %1758 = vmatprep.subr.bf16.mxu1 %v2240_v5 }
 0x383   : > { %v794_v24 = vpop.f32.mrb[8].mxu0 }
 0x384   : > { %v801_v26 = vmul.f32 0.088388346, %v794_v24  ;;  %v1750_v27 = vpop.f32.mrb[9].mxu0 }
 0x385   : > { %v797_v28 = vpop.f32.mrb[10].mxu0 }
 0x386   : > { %v802_v30 = vmul.f32 0.088388346, %v797_v28  ;;  %v1751_v31 = vpop.f32.mrb[11].mxu0  ;;  %v805_v32 = vadd.f32 %v803_v25, %v801_v26  ;;  %v1981_v26 = vld [vmem:[%s2520_s10 + $0x100] sm:$0xff]  }
 0x387   : > { %1779 = vmatpush3.bf16.msra.mxu0 %v1981_v26 }
 0x388   : > { %v808_v33 = vsel %vm807_vm1, %v805_v32, -inf  ;;  %v806_v34 = vadd.f32 %v804_v29, %v802_v30  ;;  %1780 = vmatprep.subr.bf16.mxu0 %v2240_v5 }
 0x389   : > { %809 = vmax.xlane.f32.xlu0 %v808_v33  ;;  %v1982_v33 = vld [vmem:[%s2520_s10 + $0x108] sm:$0xff]  }
 0x38a   : > { %v811_v35 = vsel %vm807_vm1, %v806_v34, -inf }
 0x38b   : > { %812 = vmax.xlane.f32.xlu1 %v811_v35  ;;  %1781 = vmatpush3.bf16.msra.mxu0 %v1982_v33  ;;  %v1984_v35 = vld [vmem:[%s2520_s10 + $0x118] sm:$0xff]  }
 0x38c   : > { %1782 = vmatprep.subr.bf16.mxu0 %v2240_v5 }
 0x416   : > { %v810_v36 = vpop.xlane.xlu0 %809 }
 0x417   : > { %v814_v40 = vsub.f32 %v805_v32, %v810_v36  ;;  %v1985_v36 = vld [vmem:[%s2520_s10 + $0x120] sm:$0xff]  }
 0x418   : > { %v813_v41 = vpop.xlane.xlu1 %812 }
 0x419   : > { %v816_v42 = vmul.f32 1.442695, %v814_v40  ;;  %v815_v44 = vsub.f32 %v806_v34, %v813_v41  ;;  %v1983_v34 = vld [vmem:[%s2520_s10 + $0x110] sm:$0xff]   ;;  %v1986_v40 = vld [vmem:[%s2520_s10 + $0x128] sm:$0xff]  }
 0x41a   : > { %1783 = vmatpush3.bf16.msra.mxu0 %v1983_v34  ;;  %v1987_v41 = vld [vmem:[%s2520_s10 + $0x130] sm:$0xff]  }
 0x41b   : > { %2001 = vpow2.f32 %v816_v42  ;;  %v818_v45 = vmul.f32 1.442695, %v815_v44  ;;  %1784 = vmatprep.subr.bf16.mxu0 %v2240_v5  ;;  %v1988_v42 = vld [vmem:[%s2520_s10 + $0x138] sm:$0xff]   ;;  %v1989_v44 = vld [vmem:[%s2520_s10 + $0x140] sm:$0xff]  }
 0x41d   : > { %2003 = vpow2.f32 %v818_v45  ;;  %v1990_v45 = vld [vmem:[%s2520_s10 + $0x148] sm:$0xff]  }
 0x41e   : > { %1785 = vmatpush3.bf16.msra.mxu0 %v1984_v35 }
 0x41f   : > { %1786 = vmatprep.subr.bf16.mxu0 %v2240_v5 }
 0x422   : > { %1787 = vmatpush3.bf16.msra.mxu0 %v1985_v36 }
 0x423   : > { %1788 = vmatprep.subr.bf16.mxu0 %v2240_v5 }
 0x425   : > { %v2002_v46 = vpop.eup %2001 }
 0x426   : > { %v820_v47 = vsel %vm807_vm1, %v2002_v46, 0.0  ;;  %1789 = vmatpush3.bf16.msra.mxu0 %v1986_v40 }
 0x427   : > { %v2004_v48 = vpop.eup %2003  ;;  %821 = vadd.xlane.f32.xlu0 %v820_v47  ;;  %1790 = vmatprep.subr.bf16.mxu0 %v2240_v5  ;;  %v1992_v47 = vld [vmem:[%s2520_s10 + $0x158] sm:$0xff]  }
 0x428   : > { %v823_v51 = vsel %vm807_vm1, %v2004_v48, 0.0 }
 0x429   : > { %824 = vadd.xlane.f32.xlu1 %v823_v51  ;;  %v1994_v51 = vld [vmem:[%s2520_s10 + $0x168] sm:$0xff]  }
 0x42a   : > { %1791 = vmatpush3.bf16.msra.mxu0 %v1987_v41 }
 0x42b   : > { %1792 = vmatprep.subr.bf16.mxu0 %v2240_v5 }
 0x42e   : > { %1793 = vmatpush3.bf16.msra.mxu0 %v1988_v42 }
 0x43a   : > { %995 = vperm.xlu1 %1948, %v388_v4  }
 0x43d   : > { %990 = vperm.xlu0 %1947, %v387_v3  }
 0x4b4   : > { %v822_v52 = vpop.xlane.xlu0 %821 }
 0x4b5   : > { %2005 = vrcp.f32 %v822_v52 }
 0x4b6   : > { %v825_v53 = vpop.xlane.xlu1 %824 }
 0x4b7   : > { %2007 = vrcp.f32 %v825_v53 }
 0x4ba   : > { %v2671_v22 = vpop.permute.xlu1 %995 }
 0x4bc   : > { %v2668_v18 = vpop.permute.xlu0 %990 }
 0x4bf   : > { %v2006_v54 = vpop.eup %2005 }
 0x4c0   : > { %v828_v56 = vmul.f32 %v2006_v54, %v2002_v46  ;;  %v1991_v46 = vld [vmem:[%s2520_s10 + $0x150] sm:$0xff]  }
 0x4c1   : > { %v2008_v55 = vpop.eup %2007 }
 0x4c2   : > { %v829_v57 = vmul.f32 %v2008_v55, %v2004_v48  ;;  %v1993_v48 = vld [vmem:[%s2520_s10 + $0x160] sm:$0xff]  }
 0x4c4   : > { %v830_v59 = vpack.c.bf16 %v829_v57, %v828_v56 }
 0x4c6   : > { %1755 = vmatmul.mubr.msk.bf16.vlgmr.msra.gmra.mrb[4].mxu1 %vm807_vm1, %v830_v59 }
 0x4c7   : > { %1759 = vmatpush3.bf16.msra.mxu1 %v1973_v58  ;;  %1774 = vmatprep.mubr.msk.bf16.mxu1 %vm2241_vm0, %v2240_v5  ;;  %v1024_v58 = vsub.s32 6, %v2589_v37 }
 0x4c8   : > { %1760 = vmatprep.subr.bf16.mxu1 %v2240_v5 }
 0x4cb   : > { %1761 = vmatpush3.bf16.msra.mxu1 %v1974_v60 }
 0x4cc   : > { %1762 = vmatprep.subr.bf16.mxu1 %v2240_v5 }
 0x4cf   : > { %1763 = vmatpush3.bf16.msra.mxu1 %v1975_v61  ;;  %v1025_v61 = vrot.slane %v2594_v39, %v1024_v58 }
 0x4d0   : > { %1764 = vmatprep.subr.bf16.mxu1 %v2240_v5 }
 0x4d3   : > { %1765 = vmatpush3.bf16.msra.mxu1 %v1976_v62  ;;  %v1030_v62 = vsub.s32 7, %v2589_v37 }
 0x4d4   : > { %1766 = vmatprep.subr.bf16.mxu1 %v2240_v5 }
 0x4d7   : > { %1767 = vmatpush3.bf16.msra.mxu1 %v1977_v63 }
 0x4d8   : > { %1768 = vmatprep.subr.bf16.mxu1 %v2240_v5 }
 0x4db   : > { %1769 = vmatpush3.bf16.msra.mxu1 %v1978_v0 }
 0x4dc   : > { %1770 = vmatprep.subr.bf16.mxu1 %v2240_v5 }
 0x4df   : > { %1771 = vmatpush3.bf16.msra.mxu1 %v1979_v1 }
 0x4e0   : > { %1772 = vmatprep.subr.bf16.mxu1 %v2240_v5 }
 0x4e3   : > { %1773 = vmatpush3.bf16.msra.mxu1 %v1980_v2  ;;  %v1031_v2 = vrot.slane %v2594_v39, %v1030_v62 }
 0x4e4   : > { %1798 = vmatprep.subr.bf16.mxu1 %v2240_v5 }
 0x599   : > { %v868_v7 = vpop.f32.mrb[4].mxu1 }
 0x59a   : > { %v1756_v8 = vpop.f32.mrb[5].mxu1 }
 0x59b   : > { %v871_v9 = vpop.f32.mrb[6].mxu1  ;;  %v1995_v8 = vld [vmem:[%s2520_s10 + $0x170] sm:$0xff]  }
 0x59c   : > { %v875_v10 = vpack.c.bf16 %v871_v9, %v868_v7  ;;  %v1757_v11 = vpop.f32.mrb[7].mxu1  ;;  %v1996_v9 = vld [vmem:[%s2520_s10 + $0x178] sm:$0xff]  }
 0x59e   : > { %1775 = vmatmul.mubr.bf16.vlgmr.msra.gmra.mrb[8].mxu1 %v875_v10  ;;  %v390_v10 = vld [vmem:[%s321_s14 + $0x8] sm:$0xff] }
 0x59f   : > { %1814 = vmatprep.mubr.msk.bf16.mxu1 %vm2241_vm0, %v2240_v5  ;;  %1799 = vmatpush3.bf16.msra.mxu1 %v1989_v44  ;;  %v1055_v11 = vrot.slane %v390_v10, %v416_v38 }
 0x5a0   : > { %1800 = vmatprep.subr.bf16.mxu1 %v2240_v5 }
 0x5a3   : > { %1801 = vmatpush3.bf16.msra.mxu1 %v1990_v45 }
 0x5a4   : > { %1802 = vmatprep.subr.bf16.mxu1 %v2240_v5 }
 0x5a7   : > { %1803 = vmatpush3.bf16.msra.mxu1 %v1991_v46 }
 0x5a8   : > { %1804 = vmatprep.subr.bf16.mxu1 %v2240_v5 }
 0x5ab   : > { %1805 = vmatpush3.bf16.msra.mxu1 %v1992_v47 }
 0x5ac   : > { %1806 = vmatprep.subr.bf16.mxu1 %v2240_v5 }
 0x5af   : > { %1807 = vmatpush3.bf16.msra.mxu1 %v1993_v48 }
 0x5b0   : > { %1808 = vmatprep.subr.bf16.mxu1 %v2240_v5 }
 0x5b3   : > { %1809 = vmatpush3.bf16.msra.mxu1 %v1994_v51 }
 0x5b4   : > { %1810 = vmatprep.subr.bf16.mxu1 %v2240_v5 }
 0x5b7   : > { %1811 = vmatpush3.bf16.msra.mxu1 %v1995_v8 }
 0x5b8   : > { %1812 = vmatprep.subr.bf16.mxu1 %v2240_v5  ;;  %v1168_v5 = vrot.slane %v390_v10, %v422_v43 }
 0x5bb   : > { %1813 = vmatpush3.bf16.msra.mxu1 %v1996_v9 }
 0x671   : > { %v979_v14 = vpop.f32.mrb[8].mxu1 }
 0x672   : > { %v980_v15 = vadd.f32 %v979_v14, %v896_v13  ;;  %v1776_v16 = vpop.f32.mrb[9].mxu1 }
 0x673   : > { %v982_v17 = vpop.f32.mrb[10].mxu1 }
 0x674   : > { %v986_v19 = vadd.f32 %v980_v15, %v2603_v49  ;;  %v983_v20 = vadd.f32 %v982_v17, %v896_v13  ;;  %v1777_v21 = vpop.f32.mrb[11].mxu1 }
 0x676   : > { %v987_v23 = vadd.f32 %v983_v20, %v2605_v50  ;;  %v998_v24 = vmul.f32 %v2668_v18, %v986_v19 }
 0x678   : > { %1000 = vadd.xlane.f32.xlu1 %v998_v24  ;;  %v999_v25 = vmul.f32 %v2671_v22, %v987_v23 }
 0x67a   : > { %1002 = vadd.xlane.f32.xlu0 %v999_v25 }
 0x705   : > { %v1001_v27 = vpop.xlane.xlu1 %1000 }
 0x706   : > { %v1004_v49 = vmul.f32 0.0078125, %v1001_v27 }
 0x707   : > { %v1003_v28 = vpop.xlane.xlu0 %1002 }
 0x708   : > { %v1006_v29 = vsub.f32 %v998_v24, %v1004_v49  ;;  %v1005_v30 = vmul.f32 0.0078125, %v1003_v28 }
 0x70a   : > { %v1007_v50 = vsub.f32 %v999_v25, %v1005_v30  ;;  %v1008_v31 = vmul.f32 %v1006_v29, %v1006_v29 }
 0x70c   : > { %1010 = vadd.xlane.f32.xlu1 %v1008_v31  ;;  %v1009_v32 = vmul.f32 %v1007_v50, %v1007_v50 }
 0x710   : > { %1012 = vadd.xlane.f32.xlu1 %v1009_v32 }
 0x799   : > { %v1011_v52 = vpop.xlane.xlu1 %1010 }
 0x79a   : > { %v1014_v53 = vmul.f32 0.0078125, %v1011_v52 }
 0x79c   : > { %v1016_v54 = vadd.f32 1e-08, %v1014_v53 }
 0x79d   : > { %v1013_v55 = vpop.xlane.xlu1 %1012 }
 0x79e   : > { %2009 = vrsqrt.f32 %v1016_v54  ;;  %v1015_v56 = vmul.f32 0.0078125, %v1013_v55 }
 0x7a0   : > { %v1017_v57 = vadd.f32 1e-08, %v1015_v56 }
 0x7a2   : > { %2011 = vrsqrt.f32 %v1017_v57 }
 0x7a8   : > { %v2010_v59 = vpop.eup %2009 }
 0x7a9   : > { %v1020_v60 = vmul.f32 %v2010_v59, %v1006_v29 }
 0x7ab   : > { %v1026_v1 = vmul.f32 %v1025_v61, %v1020_v60 }
 0x7ac   : > { %v2012_v63 = vpop.eup %2011 }
 0x7ad   : > { %v1021_v0 = vmul.f32 %v2012_v63, %v1007_v50  ;;  %v1032_v4 = vadd.f32 %v1031_v2, %v1026_v1 }
 0x7af   : > { %v1027_v3 = vmul.f32 %v1025_v61, %v1021_v0 }
 0x7b1   : > { %v1033_v6 = vadd.f32 %v1031_v2, %v1027_v3 }
 0x7b3   : > { %v1034_v7 = vpack.c.bf16 %v1033_v6, %v1032_v4 }
 0x7b5   : > { %1795 = vmatmul.mubr.bf16.vlgmr.msra.gmra.mrb[12].mxu0 %v1034_v7 }
 0x888   : > { %v1138_v12 = vpop.f32.mrb[12].mxu0 }
 0x889   : > { %v1139_v13 = vadd.f32 %v1138_v12, %v1055_v11  ;;  %v1796_v14 = vpop.f32.mrb[13].mxu0 }
 0x88a   : > { %v1141_v39 = vpop.f32.mrb[14].mxu0 }
 0x88b   : > { %v1142_v15 = vadd.f32 %v1141_v39, %v1055_v11  ;;  %v1797_v16 = vpop.f32.mrb[15].mxu0  ;;  %v1145_v17 = vmax.f32 %v1139_v13, 0.0 }
 0x88d   : > { %v1146_v19 = vmax.f32 %v1142_v15, 0.0 }
 0x88f   : > { %v1147_v20 = vpack.c.bf16 %v1146_v19, %v1145_v17 }
 0x891   : > { %1815 = vmatmul.mubr.bf16.vlgmr.msra.gmra.mrb[12].mxu1 %v1147_v20 }
 0x964   : > { %v1251_v21 = vpop.f32.mrb[12].mxu1 }
 0x965   : > { %v1252_v23 = vadd.f32 %v1251_v21, %v1168_v5  ;;  %v1816_v24 = vpop.f32.mrb[13].mxu1  ;;  %1266 = sbr.rel (%p1612_p4) target bundleno = 2414 (0x96e), region = 64 }
 0x966   : > { %v1254_v25 = vpop.f32.mrb[14].mxu1 }
 0x967   : > { %v1258_v26 = vadd.f32 %v1252_v23, %v1032_v4  ;;  %v1255_v27 = vadd.f32 %v1254_v25, %v1168_v5  ;;  %v1817_v38 = vpop.f32.mrb[15].mxu1 }
 0x969   : > { %v1260_v49 = vmul.f32 %v1258_v26, %v2668_v18  ;;  %v1259_v28 = vadd.f32 %v1255_v27, %v1033_v6 }
 0x96b   : > { %v1261_v29 = vmul.f32 %v1259_v28, %v2671_v22  ;;  %1267 = vst [vmem:[%s2542_s29] sm:$0xff] (!%p1612_p4), %v1260_v49 }
 0x96d   : > { %1268 = vst [vmem:[%s2542_s29 + $0x8] sm:$0xff] %v1261_v29 }
 0x96e PF: > { %p1613_p0 = scmp.ne.s32.totalorder %s2215_s27, 1 }
 0x96f   : > { %1274 = vadd.xlane.f32.xlu0 (!%p1613_p0), %v1260_v49  ;;  %v1614_v44 = vld [vmem:[%s2807_s5] ss:$0 sm:$0xff] (!%p1613_p0)  ;;  %v1615_v46 = vld [vmem:[%s2807_s5 + $0x1] ss:$0 sm:$0xff] (!%p1613_p0) }
 0x970   : > { %1271 = sbr.rel (%p1613_p0) target bundleno = 2731 (0xaab), region = 68 }
 0x973   : > { %1276 = vadd.xlane.f32.xlu0 (!%p1613_p0), %v1261_v29 }
 0x9fc   : > { %v1275_v37 = vpop.xlane.xlu0 %1274 }
 0x9fd   : > { %v1278_v43 = vmul.f32 0.0078125, %v1275_v37 }
 0x9ff   : > { %v1280_v30 = vsub.f32 %v1260_v49, %v1278_v43 }
 0xa00   : > { %v1277_v18 = vpop.xlane.xlu0 %1276 }
 0xa01   : > { %v1279_v50 = vmul.f32 0.0078125, %v1277_v18  ;;  %v1282_v31 = vmul.f32 %v1280_v30, %v1280_v30 }
 0xa03   : > { %v1281_v22 = vsub.f32 %v1261_v29, %v1279_v50  ;;  %1284 = vadd.xlane.f32.xlu1 %v1282_v31 }
 0xa05   : > { %v1283_v32 = vmul.f32 %v1281_v22, %v1281_v22 }
 0xa07   : > { %1286 = vadd.xlane.f32.xlu1 %v1283_v32 }
 0xa90   : > { %v1285_v33 = vpop.xlane.xlu1 %1284 }
 0xa91   : > { %v1288_v34 = vmul.f32 0.0078125, %v1285_v33 }
 0xa93   : > { %v1290_v35 = vadd.f32 1e-08, %v1288_v34 }
 0xa94   : > { %v1287_v36 = vpop.xlane.xlu1 %1286 }
 0xa95   : > { %2013 = vrsqrt.f32 %v1290_v35  ;;  %v1289_v40 = vmul.f32 0.0078125, %v1287_v36 }
 0xa97   : > { %v1291_v41 = vadd.f32 1e-08, %v1289_v40 }
 0xa99   : > { %2015 = vrsqrt.f32 %v1291_v41 }
 0xa9f   : > { %v2014_v42 = vpop.eup %2013 }
 0xaa0   : > { %v1294_v45 = vmul.f32 %v2014_v42, %v1280_v30 }
 0xaa2   : > { %v1300_v47 = vmul.f32 %v1614_v44, %v1294_v45 }
 0xaa3   : > { %v2016_v48 = vpop.eup %2015 }
 0xaa4   : > { %v1306_v51 = vadd.f32 %v1615_v46, %v1300_v47  ;;  %v1295_v52 = vmul.f32 %v2016_v48, %v1281_v22 }
 0xaa6   : > { %1308 = vst [vmem:[%s2542_s29] sm:$0xff] %v1306_v51  ;;  %v1301_v53 = vmul.f32 %v1614_v44, %v1295_v52 }
 0xaa8   : > { %v1307_v54 = vadd.f32 %v1615_v46, %v1301_v53 }
 0xaaa   : > { %1309 = vst [vmem:[%s2542_s29 + $0x8] sm:$0xff] %v1307_v54 }
 0xaab PF: > { %s1626_s17 = sshll.u32 %s2219_s28, 8  ;;  %s1324_s13 = sshll.u32 %s2542_s29, 4  ;;  %s2737_s13 = int_to_ptr.vmem [resolvable:$true] %s1324_s13 }
 0xaac   : > { %s2734_s12 = scalar_lea.hbm %s2808_s6, %s1626_s17  ;;  %s2741_s19 = scalar_lea.sflag [#allocation4], %s362_s15 }
 0xaad   : > { %s2105_s8 = scalar_lea.vmem %s2737_s13, 256  ;;  %p2852_p10 = scmp.ne.s32.totalorder %s2840_s9, 0 }
 0xaae   : > { %p2106_p12 = scmp.ne.s32.totalorder %s2737_s13, %s2105_s8  ;;  %s2243_s28 = smov [#allocation8]  }
 0xaaf   : > { %s2109_s21 = sshll.u32 %s2243_s28, 4  ;;  %s2110_s21 = int_to_ptr.vmem [resolvable:$false] %s2109_s21 }
 0xab0   : > { %p2107_p2 = pnand %p2106_p12, %p2852_p10  ;;  %s2111_s23 = scalar_lea.vmem %s2110_s21, 512 }
 0xab1   : > { %p2112_p1 = scmp.lt.s32.totalorder %s2737_s13, %s2110_s21  ;;  %p2113_p8 = scmp.lt.s32.totalorder %s2111_s23, %s2105_s8 }
 0xab2   : > { %p2108_p3 = pneg %p2107_p2 }
 0xab3   : > { %p2114_p13 = por %p2113_p8, %p2112_p1 }
 0xab5   : > { %p2115_p5 = pnand %p2114_p13, %p2108_p3 }
 0xab7   : > { %2118 = shalt.err (!%p2115_p5)
}
 0xab8   : > { %s2119_s15 = scalar_lea.hbm %s2734_s12, 256  ;;  %s2123_s3 = scalar_lea.hbm %s2808_s6, 512 }
 0xab9   : > { %p2120_p6 = scmp.ne.s32.totalorder %s2734_s12, %s2119_s15  ;;  %p2124_p11 = scmp.lt.u32.totalorder %s2734_s12, %s2808_s6 }
 0xaba   : > { %p2125_p4 = scmp.lt.u32.totalorder %s2123_s3, %s2119_s15  ;;  %p2127_p12 = scmp.lt.u32.totalorder %s2119_s15, %s2734_s12 }
 0xabb   : > { %p2121_p9 = pnand %p2120_p6, %p2852_p10 }
 0xabc   : > { %p2126_p0 = por %p2125_p4, %p2124_p11 }
 0xabd   : > { %p2122_p7 = pneg %p2121_p9 }
 0xabe   : > { %p2128_p2 = por %p2127_p12, %p2126_p0 }
 0xac0   : > { %p2129_p3 = pnand %p2128_p2, %p2122_p7 }
 0xac2   : > { %2132 = shalt.err (!%p2129_p3)
}
 0xac3   : > { %s2244_s29 = smov 128   ;;  %s2245_s27 = smov 8  }
 0xac4   : > { %1828 = dma.vmem_to_hbm [thread:$0]  (%p2852_p10), %s2737_s13, 256, %s2734_s12, %s2741_s19, %s2244_s29, %s2244_s29, %s2245_s27  }
 0xac5 PF: > { %s2853_s20 = sld [smem:[#allocation12_spill]]  ;;  %s2854_s18 = sld [smem:[#allocation21_spill]] }
 0xac6   : > { %p1848_p1 = scmp.ge.s32.totalorder %s2231_s7, 2 }
 0xacb   : > { %s1339_s24 = sand.u32 1, %s2853_s20   ;;  %p2855_p8 = scmp.ne.s32.totalorder %s2854_s18, 0 }
 0xacc   : > { %s1340_s17 = scalar_lea.sflag [#allocation4], %s1339_s24 }
 0xacd   : > { %p1842_p13 = pnand %p1848_p1, %p2855_p8 }
 0xacf   : > { %2186 = dma.done.wait (!%p1842_p13), %s1340_s17, 256  }
 0xad0   : > { %2188 = vsyncadd (!%p1842_p13), %s1340_s17, 4294967040  ;;  %s23_s7 = sadd.s32 1, %s2231_s7   ;;  %s2856_s11 = sld [smem:[#allocation13_spill]] }
 0xad1   : > { %p20_p5 = scmp.ge.s32.totalorder %s23_s7, 6   ;;  %s2857_s23 = sld [smem:[#allocation20_spill]] }
 0xad2   : > { %s2858_s9 = sld [smem:[#allocation14_spill]]  ;;  %s2859_s26 = sld [smem:[#allocation19_spill]] }
 0xad3   : > { %s2860_s27 = sld [smem:[#allocation15_spill]]  ;;  %s2861_s28 = sld [smem:[#allocation16_spill]] }
 0xad4   : > { %s2862_s29 = sld [smem:[#allocation17_spill]]  ;;  %s2863_s30 = sld [smem:[#allocation18_spill]] }
 0xad5   : > { %s2864_s21 = smov %s2195_s22  ;;  %s2866_s24 = smov %s2207_s25 }
 0xad6   : > { %s2865_s22 = smov %s2856_s11  ;;  %22 = sbr.rel (!%p20_p5) target bundleno = 12 (0xc), region = 128 }
 0xad8   : > { %s2867_s25 = smov %s2858_s9 }
 0xadd   :  { %1345 = vsyncpa [#allocation3], 1 }
 0xade   :  { %1347 = vsyncpa [#allocation3 + $0x1], 1 }
 0xadf   :  { %1348 = vsyncpa [#allocation6], 1 }
 0xae0   :  { %1350 = vsyncpa [#allocation6 + $0x1], 1 }
 0xae1   :  { %1351 = vsyncpa [#allocation4], 1 }
 0xae2   :  { %1353 = vsyncpa [#allocation4 + $0x1], 1 }

</bundles_post_ra>
